<compile_context>
chip_gen: v7x
topology: tpu7x:2x2x1
jax: 0.10.0
libtpu: 0.0.40
codegen_flags: <defaults>
</compile_context>

<pallas_src>
import jax
import jax.numpy as jnp
import numpy as np
from jax import lax
from jax.experimental import pallas as pl
from jax.experimental.pallas import tpu as pltpu

_BN_EPS = 1e-5


# ------------------------------ Pallas kernel ------------------------------ #

def _make_inception_kernel(H, W):
    """One fused kernel: all six ConvBn(conv+BN+ReLU) stages + channel concat."""

    def kernel(x_ref, w1_ref, s1_ref, c1_ref,
               w12_ref, s12_ref, c12_ref,
               w13_ref, s13_ref, c13_ref,
               w22_ref, s22_ref, c22_ref,
               o_ref, pad16_ref, pad32_ref):
        # x_ref:   (B, H, W, 192)
        # w1_ref:  (192, 128)  fused 1x1 weights [b11(16) | b21(16) | b31(96)]
        # wXX_ref: (9*Cin, Cout) im2col weights for the 3x3 stages
        # sX/cX:   (1, Cout) folded BN scale / bias (+conv bias)
        # o_ref:   (B, H, W, 192)
        # padXX:   (B, H+2, W+2, C) zero-padded activation scratch in VMEM
        B = x_ref.shape[0]
        Cin = x_ref.shape[-1]
        M = B * H * W

        x = x_ref[...].reshape(M, Cin)

        # ---- fused 1x1 branches: one (M,192)x(192,128) MXU matmul ---- #
        y1 = jnp.dot(x, w1_ref[...], preferred_element_type=jnp.float32)
        y1 = jnp.maximum(y1 * s1_ref[...] + c1_ref[...], 0.0)
        y11 = y1[:, 0:16]     # branch11 out (-> branch12)
        y21 = y1[:, 16:32]    # branch21 out (-> branch22)
        y31 = y1[:, 32:128]   # branch31 out (right, 96 ch)

        def conv3x3(y, pad_ref, w_ref, s_ref, c_ref):
            C = pad_ref.shape[-1]
            # zero-padded activation in VMEM scratch (no host-side jnp.pad)
            pad_ref[...] = jnp.zeros_like(pad_ref)
            pad_ref[:, 1:H + 1, 1:W + 1, :] = y.reshape(B, H, W, C)
            # im2col: build one (M, 9*C) operand and do a single MXU matmul
            cols = []
            for kh in range(3):
                for kw in range(3):
                    cols.append(pad_ref[:, kh:kh + H, kw:kw + W, :].reshape(M, C))
            col = jnp.concatenate(cols, axis=-1)
            z = jnp.dot(col, w_ref[...], preferred_element_type=jnp.float32)
            return jnp.maximum(z * s_ref[...] + c_ref[...], 0.0)

        y12 = conv3x3(y11, pad16_ref, w12_ref, s12_ref, c12_ref)   # (M, 32)
        y13 = conv3x3(y12, pad32_ref, w13_ref, s13_ref, c13_ref)   # (M, 32) left
        y22 = conv3x3(y21, pad16_ref, w22_ref, s22_ref, c22_ref)   # (M, 64) mid

        # channel concat in-register, single full-width store (torch.cat dim=1)
        out = jnp.concatenate([y13, y22, y31], axis=-1)            # (M, 192)
        o_ref[...] = out.reshape(B, H, W, 192)

    return kernel


def _pick_block_b(n):
    # Several images per grid step when possible, but keep >= 2 grid steps so
    # both v7x TensorCores get work.
    for b in (8, 4, 2):
        if n % b == 0 and n // b >= 2:
            return b
    return 1


def inception3e_pallas_nhwc(x_nhwc, folded):
    N, H, W, Cin = x_nhwc.shape
    B = _pick_block_b(N)
    (w1, s1, c1, w12, s12, c12, w13, s13, c13, w22, s22, c22) = folded

    def fixed(shape):
        nd = len(shape)
        return pl.BlockSpec(shape, lambda n, _nd=nd: (0,) * _nd)

    kernel = _make_inception_kernel(H, W)
    return pl.pallas_call(
        kernel,
        out_shape=jax.ShapeDtypeStruct((N, H, W, 192), jnp.float32),
        grid=(N // B,),
        in_specs=[
            pl.BlockSpec((B, H, W, Cin), lambda n: (n, 0, 0, 0)),
            fixed(w1.shape), fixed(s1.shape), fixed(c1.shape),
            fixed(w12.shape), fixed(s12.shape), fixed(c12.shape),
            fixed(w13.shape), fixed(s13.shape), fixed(c13.shape),
            fixed(w22.shape), fixed(s22.shape), fixed(c22.shape),
        ],
        out_specs=pl.BlockSpec((B, H, W, 192), lambda n: (n, 0, 0, 0)),
        scratch_shapes=[
            pltpu.VMEM((B, H + 2, W + 2, 16), jnp.float32),
            pltpu.VMEM((B, H + 2, W + 2, 32), jnp.float32),
        ],
        compiler_params=pltpu.CompilerParams(dimension_semantics=("parallel",)),
    )(x_nhwc, w1, s1, c1, w12, s12, c12, w13, s13, c13, w22, s22, c22)


# --------------------------- parameter handling ---------------------------- #

def init_convbn(key, cin, cout, k):
    kw_, kb, kg, kbt, km, kv = jax.random.split(key, 6)
    fan_in = cin * k * k
    return dict(
        w=jax.random.normal(kw_, (cout, cin, k, k), jnp.float32) / np.sqrt(fan_in),
        b=0.1 * jax.random.normal(kb, (cout,), jnp.float32),
        gamma=1.0 + 0.1 * jax.random.normal(kg, (cout,), jnp.float32),
        beta=0.1 * jax.random.normal(kbt, (cout,), jnp.float32),
        mean=0.1 * jax.random.normal(km, (cout,), jnp.float32),
        var=1.0 + 0.5 * jax.random.uniform(kv, (cout,), jnp.float32),
    )


def _fold_scale_bias(p):
    scale = p["gamma"] / jnp.sqrt(p["var"] + _BN_EPS)
    bias = p["beta"] + (p["b"] - p["mean"]) * scale
    return scale, bias


def _fold_1x1(p):
    scale, bias = _fold_scale_bias(p)
    w = p["w"][:, :, 0, 0].T  # (cin, cout)
    return w, scale, bias


def _fold_3x3(p):
    scale, bias = _fold_scale_bias(p)
    cout, cin, k, _ = p["w"].shape
    # OIHW -> (KH, KW, Cin, Cout) -> (K*K*Cin, Cout), matching the im2col order.
    w = jnp.transpose(p["w"], (2, 3, 1, 0)).reshape(k * k * cin, cout)
    return w, scale, bias


def fold_inception_params(params):
    w11, s11, c11 = _fold_1x1(params["b11"])
    w21, s21, c21 = _fold_1x1(params["b21"])
    w31, s31, c31 = _fold_1x1(params["b31"])
    w1 = jnp.concatenate([w11, w21, w31], axis=1)            # (192, 128)
    s1 = jnp.concatenate([s11, s21, s31]).reshape(1, 128)
    c1 = jnp.concatenate([c11, c21, c31]).reshape(1, 128)
    w12, s12, c12 = _fold_3x3(params["b12"])                 # (144, 32)
    w13, s13, c13 = _fold_3x3(params["b13"])                 # (288, 32)
    w22, s22, c22 = _fold_3x3(params["b22"])                 # (144, 64)
    return (w1, s1, c1,
            w12, s12.reshape(1, -1), c12.reshape(1, -1),
            w13, s13.reshape(1, -1), c13.reshape(1, -1),
            w22, s22.reshape(1, -1), c22.reshape(1, -1))


# ------------------------------ Inception3e -------------------------------- #

def init_inception3e(key):
    keys = jax.random.split(key, 6)
    return dict(
        b11=init_convbn(keys[0], 192, 16, 1),
        b12=init_convbn(keys[1], 16, 32, 3),
        b13=init_convbn(keys[2], 32, 32, 3),
        b21=init_convbn(keys[3], 192, 16, 1),
        b22=init_convbn(keys[4], 16, 64, 3),
        b31=init_convbn(keys[5], 192, 96, 1),
    )


@jax.jit
def inception3e_forward(x_nchw, params):
    x = jnp.transpose(x_nchw, (0, 2, 3, 1))          # NCHW -> NHWC (once)
    folded = fold_inception_params(params)
    out = inception3e_pallas_nhwc(x, folded)
    return jnp.transpose(out, (0, 3, 1, 2))          # back to NCHW


# ----------------------------- pure-JAX reference --------------------------- #

def _ref_convbn(x_nchw, p, pad):
    y = lax.conv_general_dilated(
        x_nchw, p["w"], window_strides=(1, 1),
        padding=[(pad, pad), (pad, pad)],
        dimension_numbers=("NCHW", "OIHW", "NCHW"),
    )
    y = y + p["b"][None, :, None, None]
    y = (y - p["mean"][None, :, None, None]) / jnp.sqrt(p["var"] + _BN_EPS)[None, :, None, None]
    y = y * p["gamma"][None, :, None, None] + p["beta"][None, :, None, None]
    return jnp.maximum(y, 0.0)


def inception3e_ref(x_nchw, params):
    left = _ref_convbn(x_nchw, params["b11"], 0)
    left = _ref_convbn(left, params["b12"], 1)
    left = _ref_convbn(left, params["b13"], 1)
    mid = _ref_convbn(x_nchw, params["b21"], 0)
    mid = _ref_convbn(mid, params["b22"], 1)
    right = _ref_convbn(x_nchw, params["b31"], 0)
    return jnp.concatenate([left, mid, right], axis=1)


# ----------------------------------- main ----------------------------------- #

if __name__ == "__main__":
    key = jax.random.PRNGKey(0)
    k_x, k_p = jax.random.split(key)

    N, C, H, W = 2, 192, 8, 8  # module requires 192 input channels
    x = jax.random.normal(k_x, (N, C, H, W), jnp.float32)
    params = init_inception3e(k_p)

    out = jax.block_until_ready(inception3e_forward(x, params))
    assert out.shape == (N, 32 + 64 + 96, H, W), out.shape

    ref = jax.block_until_ready(inception3e_ref(x, params))
    np.testing.assert_allclose(np.asarray(out), np.asarray(ref), rtol=1e-3, atol=1e-3)

    print("KERNEL_OK")
</pallas_src>

<mosaic_0001>
module attributes {stable_mosaic.version = 11 : i64} {
  func.func @kernel(%arg0: i32, %arg1: memref<1x8x8x192xf32, #tpu.memory_space<vmem>>, %arg2: memref<192x128xf32, #tpu.memory_space<vmem>>, %arg3: memref<1x128xf32, #tpu.memory_space<vmem>>, %arg4: memref<1x128xf32, #tpu.memory_space<vmem>>, %arg5: memref<144x32xf32, #tpu.memory_space<vmem>>, %arg6: memref<1x32xf32, #tpu.memory_space<vmem>>, %arg7: memref<1x32xf32, #tpu.memory_space<vmem>>, %arg8: memref<288x32xf32, #tpu.memory_space<vmem>>, %arg9: memref<1x32xf32, #tpu.memory_space<vmem>>, %arg10: memref<1x32xf32, #tpu.memory_space<vmem>>, %arg11: memref<144x64xf32, #tpu.memory_space<vmem>>, %arg12: memref<1x64xf32, #tpu.memory_space<vmem>>, %arg13: memref<1x64xf32, #tpu.memory_space<vmem>>, %arg14: memref<1x8x8x192xf32, #tpu.memory_space<vmem>>, %arg15: memref<1x10x10x16xf32, #tpu.memory_space<vmem>>, %arg16: memref<1x10x10x32xf32, #tpu.memory_space<vmem>>) attributes {dimension_semantics = [#tpu.dimension_semantics<parallel>], iteration_bounds = array<i64: 2>, scalar_prefetch = 0 : i64, scratch_operands = 2 : i64, tpu.core_type = #tpu.core_type<tc>, window_params = [{transform_indices = @transform_0, window_bounds = array<i64: 1, 8, 8, 192>}, {pipeline_mode = #tpu.pipeline_mode<synchronous>, transform_indices = @transform_1, window_bounds = array<i64: 192, 128>}, {pipeline_mode = #tpu.pipeline_mode<synchronous>, transform_indices = @transform_2, window_bounds = array<i64: 1, 128>}, {pipeline_mode = #tpu.pipeline_mode<synchronous>, transform_indices = @transform_3, window_bounds = array<i64: 1, 128>}, {pipeline_mode = #tpu.pipeline_mode<synchronous>, transform_indices = @transform_4, window_bounds = array<i64: 144, 32>}, {pipeline_mode = #tpu.pipeline_mode<synchronous>, transform_indices = @transform_5, window_bounds = array<i64: 1, 32>}, {pipeline_mode = #tpu.pipeline_mode<synchronous>, transform_indices = @transform_6, window_bounds = array<i64: 1, 32>}, {pipeline_mode = #tpu.pipeline_mode<synchronous>, transform_indices = @transform_7, window_bounds = array<i64: 288, 32>}, {pipeline_mode = #tpu.pipeline_mode<synchronous>, transform_indices = @transform_8, window_bounds = array<i64: 1, 32>}, {pipeline_mode = #tpu.pipeline_mode<synchronous>, transform_indices = @transform_9, window_bounds = array<i64: 1, 32>}, {pipeline_mode = #tpu.pipeline_mode<synchronous>, transform_indices = @transform_10, window_bounds = array<i64: 144, 64>}, {pipeline_mode = #tpu.pipeline_mode<synchronous>, transform_indices = @transform_11, window_bounds = array<i64: 1, 64>}, {pipeline_mode = #tpu.pipeline_mode<synchronous>, transform_indices = @transform_12, window_bounds = array<i64: 1, 64>}, {transform_indices = @transform_13, window_bounds = array<i64: 1, 8, 8, 192>}]} {
    %c0 = arith.constant 0 : index
    %c0_0 = arith.constant 0 : index
    %c0_1 = arith.constant 0 : index
    %c0_2 = arith.constant 0 : index
    %0 = vector.load %arg1[%c0, %c0_0, %c0_1, %c0_2] : memref<1x8x8x192xf32, #tpu.memory_space<vmem>>, vector<1x8x8x192xf32>
    %1 = vector.shape_cast %0 : vector<1x8x8x192xf32> to vector<64x192xf32>
    %c0_3 = arith.constant 0 : index
    %c0_4 = arith.constant 0 : index
    %2 = vector.load %arg2[%c0_3, %c0_4] : memref<192x128xf32, #tpu.memory_space<vmem>>, vector<192x128xf32>
    %cst = arith.constant dense<0.000000e+00> : vector<64x128xf32>
    %3 = tpu.matmul %1, %2, %cst {dimension_numbers = #tpu.dot_dimension_numbers<[1], [0], [0], [1], [0, 0, 1, 1], [], []>} : vector<64x192xf32>, vector<192x128xf32>, vector<64x128xf32> -> vector<64x128xf32>
    %c0_5 = arith.constant 0 : index
    %c0_6 = arith.constant 0 : index
    %4 = vector.load %arg3[%c0_5, %c0_6] : memref<1x128xf32, #tpu.memory_space<vmem>>, vector<1x128xf32>
    %5 = vector.broadcast %4 : vector<1x128xf32> to vector<64x128xf32>
    %6 = arith.mulf %3, %5 : vector<64x128xf32>
    %c0_7 = arith.constant 0 : index
    %c0_8 = arith.constant 0 : index
    %7 = vector.load %arg4[%c0_7, %c0_8] : memref<1x128xf32, #tpu.memory_space<vmem>>, vector<1x128xf32>
    %8 = vector.broadcast %7 : vector<1x128xf32> to vector<64x128xf32>
    %9 = arith.addf %6, %8 : vector<64x128xf32>
    %cst_9 = arith.constant 0.000000e+00 : f32
    %10 = vector.broadcast %cst_9 : f32 to vector<64x128xf32>
    %11 = arith.maximumf %9, %10 : vector<64x128xf32>
    %12 = vector.extract_strided_slice %11 {offsets = [0, 0], sizes = [64, 16], strides = [1, 1]} : vector<64x128xf32> to vector<64x16xf32>
    %13 = vector.extract_strided_slice %11 {offsets = [0, 16], sizes = [64, 16], strides = [1, 1]} : vector<64x128xf32> to vector<64x16xf32>
    %14 = vector.extract_strided_slice %11 {offsets = [0, 32], sizes = [64, 96], strides = [1, 1]} : vector<64x128xf32> to vector<64x96xf32>
    %cst_10 = arith.constant 0.000000e+00 : f32
    %15 = vector.broadcast %cst_10 : f32 to vector<1x10x10x16xf32>
    %c0_11 = arith.constant 0 : index
    %c0_12 = arith.constant 0 : index
    %c0_13 = arith.constant 0 : index
    %c0_14 = arith.constant 0 : index
    %16 = vector.load %arg15[%c0_11, %c0_12, %c0_13, %c0_14] : memref<1x10x10x16xf32, #tpu.memory_space<vmem>>, vector<1x10x10x16xf32>
    tpu.vector_store %arg15[%c0_11, %c0_12, %c0_13, %c0_14], %15 {strides = array<i32>} : memref<1x10x10x16xf32, #tpu.memory_space<vmem>>, vector<1x10x10x16xf32>,
    %17 = vector.shape_cast %12 : vector<64x16xf32> to vector<1x8x8x16xf32>
    %c0_15 = arith.constant 0 : index
    %c1 = arith.constant 1 : index
    %c1_16 = arith.constant 1 : index
    %c0_17 = arith.constant 0 : index
    %18 = vector.load %arg15[%c0_15, %c1, %c1_16, %c0_17] : memref<1x10x10x16xf32, #tpu.memory_space<vmem>>, vector<1x8x8x16xf32>
    tpu.vector_store %arg15[%c0_15, %c1, %c1_16, %c0_17], %17 {strides = array<i32>} : memref<1x10x10x16xf32, #tpu.memory_space<vmem>>, vector<1x8x8x16xf32>,
    %c0_18 = arith.constant 0 : index
    %c0_19 = arith.constant 0 : index
    %c0_20 = arith.constant 0 : index
    %c0_21 = arith.constant 0 : index
    %19 = vector.load %arg15[%c0_18, %c0_19, %c0_20, %c0_21] : memref<1x10x10x16xf32, #tpu.memory_space<vmem>>, vector<1x8x8x16xf32>
    %20 = vector.shape_cast %19 : vector<1x8x8x16xf32> to vector<64x16xf32>
    %c0_22 = arith.constant 0 : index
    %c0_23 = arith.constant 0 : index
    %c1_24 = arith.constant 1 : index
    %c0_25 = arith.constant 0 : index
    %21 = vector.load %arg15[%c0_22, %c0_23, %c1_24, %c0_25] : memref<1x10x10x16xf32, #tpu.memory_space<vmem>>, vector<1x8x8x16xf32>
    %22 = vector.shape_cast %21 : vector<1x8x8x16xf32> to vector<64x16xf32>
    %c0_26 = arith.constant 0 : index
    %c0_27 = arith.constant 0 : index
    %c2 = arith.constant 2 : index
    %c0_28 = arith.constant 0 : index
    %23 = vector.load %arg15[%c0_26, %c0_27, %c2, %c0_28] : memref<1x10x10x16xf32, #tpu.memory_space<vmem>>, vector<1x8x8x16xf32>
    %24 = vector.shape_cast %23 : vector<1x8x8x16xf32> to vector<64x16xf32>
    %c0_29 = arith.constant 0 : index
    %c1_30 = arith.constant 1 : index
    %c0_31 = arith.constant 0 : index
    %c0_32 = arith.constant 0 : index
    %25 = vector.load %arg15[%c0_29, %c1_30, %c0_31, %c0_32] : memref<1x10x10x16xf32, #tpu.memory_space<vmem>>, vector<1x8x8x16xf32>
    %26 = vector.shape_cast %25 : vector<1x8x8x16xf32> to vector<64x16xf32>
    %c0_33 = arith.constant 0 : index
    %c1_34 = arith.constant 1 : index
    %c1_35 = arith.constant 1 : index
    %c0_36 = arith.constant 0 : index
    %27 = vector.load %arg15[%c0_33, %c1_34, %c1_35, %c0_36] : memref<1x10x10x16xf32, #tpu.memory_space<vmem>>, vector<1x8x8x16xf32>
    %28 = vector.shape_cast %27 : vector<1x8x8x16xf32> to vector<64x16xf32>
    %c0_37 = arith.constant 0 : index
    %c1_38 = arith.constant 1 : index
    %c2_39 = arith.constant 2 : index
    %c0_40 = arith.constant 0 : index
    %29 = vector.load %arg15[%c0_37, %c1_38, %c2_39, %c0_40] : memref<1x10x10x16xf32, #tpu.memory_space<vmem>>, vector<1x8x8x16xf32>
    %30 = vector.shape_cast %29 : vector<1x8x8x16xf32> to vector<64x16xf32>
    %c0_41 = arith.constant 0 : index
    %c2_42 = arith.constant 2 : index
    %c0_43 = arith.constant 0 : index
    %c0_44 = arith.constant 0 : index
    %31 = vector.load %arg15[%c0_41, %c2_42, %c0_43, %c0_44] : memref<1x10x10x16xf32, #tpu.memory_space<vmem>>, vector<1x8x8x16xf32>
    %32 = vector.shape_cast %31 : vector<1x8x8x16xf32> to vector<64x16xf32>
    %c0_45 = arith.constant 0 : index
    %c2_46 = arith.constant 2 : index
    %c1_47 = arith.constant 1 : index
    %c0_48 = arith.constant 0 : index
    %33 = vector.load %arg15[%c0_45, %c2_46, %c1_47, %c0_48] : memref<1x10x10x16xf32, #tpu.memory_space<vmem>>, vector<1x8x8x16xf32>
    %34 = vector.shape_cast %33 : vector<1x8x8x16xf32> to vector<64x16xf32>
    %c0_49 = arith.constant 0 : index
    %c2_50 = arith.constant 2 : index
    %c2_51 = arith.constant 2 : index
    %c0_52 = arith.constant 0 : index
    %35 = vector.load %arg15[%c0_49, %c2_50, %c2_51, %c0_52] : memref<1x10x10x16xf32, #tpu.memory_space<vmem>>, vector<1x8x8x16xf32>
    %36 = vector.shape_cast %35 : vector<1x8x8x16xf32> to vector<64x16xf32>
    %37 = tpu.concatenate %20, %22, %24, %26, %28, %30, %32, %34, %36 in 1 : vector<64x16xf32>, vector<64x16xf32>, vector<64x16xf32>, vector<64x16xf32>, vector<64x16xf32>, vector<64x16xf32>, vector<64x16xf32>, vector<64x16xf32>, vector<64x16xf32> -> vector<64x144xf32>
    %c0_53 = arith.constant 0 : index
    %c0_54 = arith.constant 0 : index
    %38 = vector.load %arg5[%c0_53, %c0_54] : memref<144x32xf32, #tpu.memory_space<vmem>>, vector<144x32xf32>
    %cst_55 = arith.constant dense<0.000000e+00> : vector<64x32xf32>
    %39 = tpu.matmul %37, %38, %cst_55 {dimension_numbers = #tpu.dot_dimension_numbers<[1], [0], [0], [1], [0, 0, 1, 1], [], []>} : vector<64x144xf32>, vector<144x32xf32>, vector<64x32xf32> -> vector<64x32xf32>
    %c0_56 = arith.constant 0 : index
    %c0_57 = arith.constant 0 : index
    %40 = vector.load %arg6[%c0_56, %c0_57] : memref<1x32xf32, #tpu.memory_space<vmem>>, vector<1x32xf32>
    %41 = vector.broadcast %40 : vector<1x32xf32> to vector<64x32xf32>
    %42 = arith.mulf %39, %41 : vector<64x32xf32>
    %c0_58 = arith.constant 0 : index
    %c0_59 = arith.constant 0 : index
    %43 = vector.load %arg7[%c0_58, %c0_59] : memref<1x32xf32, #tpu.memory_space<vmem>>, vector<1x32xf32>
    %44 = vector.broadcast %43 : vector<1x32xf32> to vector<64x32xf32>
    %45 = arith.addf %42, %44 : vector<64x32xf32>
    %cst_60 = arith.constant 0.000000e+00 : f32
    %46 = vector.broadcast %cst_60 : f32 to vector<64x32xf32>
    %47 = arith.maximumf %45, %46 : vector<64x32xf32>
    %cst_61 = arith.constant 0.000000e+00 : f32
    %48 = vector.broadcast %cst_61 : f32 to vector<1x10x10x32xf32>
    %c0_62 = arith.constant 0 : index
    %c0_63 = arith.constant 0 : index
    %c0_64 = arith.constant 0 : index
    %c0_65 = arith.constant 0 : index
    %49 = vector.load %arg16[%c0_62, %c0_63, %c0_64, %c0_65] : memref<1x10x10x32xf32, #tpu.memory_space<vmem>>, vector<1x10x10x32xf32>
    tpu.vector_store %arg16[%c0_62, %c0_63, %c0_64, %c0_65], %48 {strides = array<i32>} : memref<1x10x10x32xf32, #tpu.memory_space<vmem>>, vector<1x10x10x32xf32>,
    %50 = vector.shape_cast %47 : vector<64x32xf32> to vector<1x8x8x32xf32>
    %c0_66 = arith.constant 0 : index
    %c1_67 = arith.constant 1 : index
    %c1_68 = arith.constant 1 : index
    %c0_69 = arith.constant 0 : index
    %51 = vector.load %arg16[%c0_66, %c1_67, %c1_68, %c0_69] : memref<1x10x10x32xf32, #tpu.memory_space<vmem>>, vector<1x8x8x32xf32>
    tpu.vector_store %arg16[%c0_66, %c1_67, %c1_68, %c0_69], %50 {strides = array<i32>} : memref<1x10x10x32xf32, #tpu.memory_space<vmem>>, vector<1x8x8x32xf32>,
    %c0_70 = arith.constant 0 : index
    %c0_71 = arith.constant 0 : index
    %c0_72 = arith.constant 0 : index
    %c0_73 = arith.constant 0 : index
    %52 = vector.load %arg16[%c0_70, %c0_71, %c0_72, %c0_73] : memref<1x10x10x32xf32, #tpu.memory_space<vmem>>, vector<1x8x8x32xf32>
    %53 = vector.shape_cast %52 : vector<1x8x8x32xf32> to vector<64x32xf32>
    %c0_74 = arith.constant 0 : index
    %c0_75 = arith.constant 0 : index
    %c1_76 = arith.constant 1 : index
    %c0_77 = arith.constant 0 : index
    %54 = vector.load %arg16[%c0_74, %c0_75, %c1_76, %c0_77] : memref<1x10x10x32xf32, #tpu.memory_space<vmem>>, vector<1x8x8x32xf32>
    %55 = vector.shape_cast %54 : vector<1x8x8x32xf32> to vector<64x32xf32>
    %c0_78 = arith.constant 0 : index
    %c0_79 = arith.constant 0 : index
    %c2_80 = arith.constant 2 : index
    %c0_81 = arith.constant 0 : index
    %56 = vector.load %arg16[%c0_78, %c0_79, %c2_80, %c0_81] : memref<1x10x10x32xf32, #tpu.memory_space<vmem>>, vector<1x8x8x32xf32>
    %57 = vector.shape_cast %56 : vector<1x8x8x32xf32> to vector<64x32xf32>
    %c0_82 = arith.constant 0 : index
    %c1_83 = arith.constant 1 : index
    %c0_84 = arith.constant 0 : index
    %c0_85 = arith.constant 0 : index
    %58 = vector.load %arg16[%c0_82, %c1_83, %c0_84, %c0_85] : memref<1x10x10x32xf32, #tpu.memory_space<vmem>>, vector<1x8x8x32xf32>
    %59 = vector.shape_cast %58 : vector<1x8x8x32xf32> to vector<64x32xf32>
    %c0_86 = arith.constant 0 : index
    %c1_87 = arith.constant 1 : index
    %c1_88 = arith.constant 1 : index
    %c0_89 = arith.constant 0 : index
    %60 = vector.load %arg16[%c0_86, %c1_87, %c1_88, %c0_89] : memref<1x10x10x32xf32, #tpu.memory_space<vmem>>, vector<1x8x8x32xf32>
    %61 = vector.shape_cast %60 : vector<1x8x8x32xf32> to vector<64x32xf32>
    %c0_90 = arith.constant 0 : index
    %c1_91 = arith.constant 1 : index
    %c2_92 = arith.constant 2 : index
    %c0_93 = arith.constant 0 : index
    %62 = vector.load %arg16[%c0_90, %c1_91, %c2_92, %c0_93] : memref<1x10x10x32xf32, #tpu.memory_space<vmem>>, vector<1x8x8x32xf32>
    %63 = vector.shape_cast %62 : vector<1x8x8x32xf32> to vector<64x32xf32>
    %c0_94 = arith.constant 0 : index
    %c2_95 = arith.constant 2 : index
    %c0_96 = arith.constant 0 : index
    %c0_97 = arith.constant 0 : index
    %64 = vector.load %arg16[%c0_94, %c2_95, %c0_96, %c0_97] : memref<1x10x10x32xf32, #tpu.memory_space<vmem>>, vector<1x8x8x32xf32>
    %65 = vector.shape_cast %64 : vector<1x8x8x32xf32> to vector<64x32xf32>
    %c0_98 = arith.constant 0 : index
    %c2_99 = arith.constant 2 : index
    %c1_100 = arith.constant 1 : index
    %c0_101 = arith.constant 0 : index
    %66 = vector.load %arg16[%c0_98, %c2_99, %c1_100, %c0_101] : memref<1x10x10x32xf32, #tpu.memory_space<vmem>>, vector<1x8x8x32xf32>
    %67 = vector.shape_cast %66 : vector<1x8x8x32xf32> to vector<64x32xf32>
    %c0_102 = arith.constant 0 : index
    %c2_103 = arith.constant 2 : index
    %c2_104 = arith.constant 2 : index
    %c0_105 = arith.constant 0 : index
    %68 = vector.load %arg16[%c0_102, %c2_103, %c2_104, %c0_105] : memref<1x10x10x32xf32, #tpu.memory_space<vmem>>, vector<1x8x8x32xf32>
    %69 = vector.shape_cast %68 : vector<1x8x8x32xf32> to vector<64x32xf32>
    %70 = tpu.concatenate %53, %55, %57, %59, %61, %63, %65, %67, %69 in 1 : vector<64x32xf32>, vector<64x32xf32>, vector<64x32xf32>, vector<64x32xf32>, vector<64x32xf32>, vector<64x32xf32>, vector<64x32xf32>, vector<64x32xf32>, vector<64x32xf32> -> vector<64x288xf32>
    %c0_106 = arith.constant 0 : index
    %c0_107 = arith.constant 0 : index
    %71 = vector.load %arg8[%c0_106, %c0_107] : memref<288x32xf32, #tpu.memory_space<vmem>>, vector<288x32xf32>
    %cst_108 = arith.constant dense<0.000000e+00> : vector<64x32xf32>
    %72 = tpu.matmul %70, %71, %cst_108 {dimension_numbers = #tpu.dot_dimension_numbers<[1], [0], [0], [1], [0, 0, 1, 1], [], []>} : vector<64x288xf32>, vector<288x32xf32>, vector<64x32xf32> -> vector<64x32xf32>
    %c0_109 = arith.constant 0 : index
    %c0_110 = arith.constant 0 : index
    %73 = vector.load %arg9[%c0_109, %c0_110] : memref<1x32xf32, #tpu.memory_space<vmem>>, vector<1x32xf32>
    %74 = vector.broadcast %73 : vector<1x32xf32> to vector<64x32xf32>
    %75 = arith.mulf %72, %74 : vector<64x32xf32>
    %c0_111 = arith.constant 0 : index
    %c0_112 = arith.constant 0 : index
    %76 = vector.load %arg10[%c0_111, %c0_112] : memref<1x32xf32, #tpu.memory_space<vmem>>, vector<1x32xf32>
    %77 = vector.broadcast %76 : vector<1x32xf32> to vector<64x32xf32>
    %78 = arith.addf %75, %77 : vector<64x32xf32>
    %cst_113 = arith.constant 0.000000e+00 : f32
    %79 = vector.broadcast %cst_113 : f32 to vector<64x32xf32>
    %80 = arith.maximumf %78, %79 : vector<64x32xf32>
    %cst_114 = arith.constant 0.000000e+00 : f32
    %81 = vector.broadcast %cst_114 : f32 to vector<1x10x10x16xf32>
    %c0_115 = arith.constant 0 : index
    %c0_116 = arith.constant 0 : index
    %c0_117 = arith.constant 0 : index
    %c0_118 = arith.constant 0 : index
    %82 = vector.load %arg15[%c0_115, %c0_116, %c0_117, %c0_118] : memref<1x10x10x16xf32, #tpu.memory_space<vmem>>, vector<1x10x10x16xf32>
    tpu.vector_store %arg15[%c0_115, %c0_116, %c0_117, %c0_118], %81 {strides = array<i32>} : memref<1x10x10x16xf32, #tpu.memory_space<vmem>>, vector<1x10x10x16xf32>,
    %83 = vector.shape_cast %13 : vector<64x16xf32> to vector<1x8x8x16xf32>
    %c0_119 = arith.constant 0 : index
    %c1_120 = arith.constant 1 : index
    %c1_121 = arith.constant 1 : index
    %c0_122 = arith.constant 0 : index
    %84 = vector.load %arg15[%c0_119, %c1_120, %c1_121, %c0_122] : memref<1x10x10x16xf32, #tpu.memory_space<vmem>>, vector<1x8x8x16xf32>
    tpu.vector_store %arg15[%c0_119, %c1_120, %c1_121, %c0_122], %83 {strides = array<i32>} : memref<1x10x10x16xf32, #tpu.memory_space<vmem>>, vector<1x8x8x16xf32>,
    %c0_123 = arith.constant 0 : index
    %c0_124 = arith.constant 0 : index
    %c0_125 = arith.constant 0 : index
    %c0_126 = arith.constant 0 : index
    %85 = vector.load %arg15[%c0_123, %c0_124, %c0_125, %c0_126] : memref<1x10x10x16xf32, #tpu.memory_space<vmem>>, vector<1x8x8x16xf32>
    %86 = vector.shape_cast %85 : vector<1x8x8x16xf32> to vector<64x16xf32>
    %c0_127 = arith.constant 0 : index
    %c0_128 = arith.constant 0 : index
    %c1_129 = arith.constant 1 : index
    %c0_130 = arith.constant 0 : index
    %87 = vector.load %arg15[%c0_127, %c0_128, %c1_129, %c0_130] : memref<1x10x10x16xf32, #tpu.memory_space<vmem>>, vector<1x8x8x16xf32>
    %88 = vector.shape_cast %87 : vector<1x8x8x16xf32> to vector<64x16xf32>
    %c0_131 = arith.constant 0 : index
    %c0_132 = arith.constant 0 : index
    %c2_133 = arith.constant 2 : index
    %c0_134 = arith.constant 0 : index
    %89 = vector.load %arg15[%c0_131, %c0_132, %c2_133, %c0_134] : memref<1x10x10x16xf32, #tpu.memory_space<vmem>>, vector<1x8x8x16xf32>
    %90 = vector.shape_cast %89 : vector<1x8x8x16xf32> to vector<64x16xf32>
    %c0_135 = arith.constant 0 : index
    %c1_136 = arith.constant 1 : index
    %c0_137 = arith.constant 0 : index
    %c0_138 = arith.constant 0 : index
    %91 = vector.load %arg15[%c0_135, %c1_136, %c0_137, %c0_138] : memref<1x10x10x16xf32, #tpu.memory_space<vmem>>, vector<1x8x8x16xf32>
    %92 = vector.shape_cast %91 : vector<1x8x8x16xf32> to vector<64x16xf32>
    %c0_139 = arith.constant 0 : index
    %c1_140 = arith.constant 1 : index
    %c1_141 = arith.constant 1 : index
    %c0_142 = arith.constant 0 : index
    %93 = vector.load %arg15[%c0_139, %c1_140, %c1_141, %c0_142] : memref<1x10x10x16xf32, #tpu.memory_space<vmem>>, vector<1x8x8x16xf32>
    %94 = vector.shape_cast %93 : vector<1x8x8x16xf32> to vector<64x16xf32>
    %c0_143 = arith.constant 0 : index
    %c1_144 = arith.constant 1 : index
    %c2_145 = arith.constant 2 : index
    %c0_146 = arith.constant 0 : index
    %95 = vector.load %arg15[%c0_143, %c1_144, %c2_145, %c0_146] : memref<1x10x10x16xf32, #tpu.memory_space<vmem>>, vector<1x8x8x16xf32>
    %96 = vector.shape_cast %95 : vector<1x8x8x16xf32> to vector<64x16xf32>
    %c0_147 = arith.constant 0 : index
    %c2_148 = arith.constant 2 : index
    %c0_149 = arith.constant 0 : index
    %c0_150 = arith.constant 0 : index
    %97 = vector.load %arg15[%c0_147, %c2_148, %c0_149, %c0_150] : memref<1x10x10x16xf32, #tpu.memory_space<vmem>>, vector<1x8x8x16xf32>
    %98 = vector.shape_cast %97 : vector<1x8x8x16xf32> to vector<64x16xf32>
    %c0_151 = arith.constant 0 : index
    %c2_152 = arith.constant 2 : index
    %c1_153 = arith.constant 1 : index
    %c0_154 = arith.constant 0 : index
    %99 = vector.load %arg15[%c0_151, %c2_152, %c1_153, %c0_154] : memref<1x10x10x16xf32, #tpu.memory_space<vmem>>, vector<1x8x8x16xf32>
    %100 = vector.shape_cast %99 : vector<1x8x8x16xf32> to vector<64x16xf32>
    %c0_155 = arith.constant 0 : index
    %c2_156 = arith.constant 2 : index
    %c2_157 = arith.constant 2 : index
    %c0_158 = arith.constant 0 : index
    %101 = vector.load %arg15[%c0_155, %c2_156, %c2_157, %c0_158] : memref<1x10x10x16xf32, #tpu.memory_space<vmem>>, vector<1x8x8x16xf32>
    %102 = vector.shape_cast %101 : vector<1x8x8x16xf32> to vector<64x16xf32>
    %103 = tpu.concatenate %86, %88, %90, %92, %94, %96, %98, %100, %102 in 1 : vector<64x16xf32>, vector<64x16xf32>, vector<64x16xf32>, vector<64x16xf32>, vector<64x16xf32>, vector<64x16xf32>, vector<64x16xf32>, vector<64x16xf32>, vector<64x16xf32> -> vector<64x144xf32>
    %c0_159 = arith.constant 0 : index
    %c0_160 = arith.constant 0 : index
    %104 = vector.load %arg11[%c0_159, %c0_160] : memref<144x64xf32, #tpu.memory_space<vmem>>, vector<144x64xf32>
    %cst_161 = arith.constant dense<0.000000e+00> : vector<64x64xf32>
    %105 = tpu.matmul %103, %104, %cst_161 {dimension_numbers = #tpu.dot_dimension_numbers<[1], [0], [0], [1], [0, 0, 1, 1], [], []>} : vector<64x144xf32>, vector<144x64xf32>, vector<64x64xf32> -> vector<64x64xf32>
    %c0_162 = arith.constant 0 : index
    %c0_163 = arith.constant 0 : index
    %106 = vector.load %arg12[%c0_162, %c0_163] : memref<1x64xf32, #tpu.memory_space<vmem>>, vector<1x64xf32>
    %107 = vector.broadcast %106 : vector<1x64xf32> to vector<64x64xf32>
    %108 = arith.mulf %105, %107 : vector<64x64xf32>
    %c0_164 = arith.constant 0 : index
    %c0_165 = arith.constant 0 : index
    %109 = vector.load %arg13[%c0_164, %c0_165] : memref<1x64xf32, #tpu.memory_space<vmem>>, vector<1x64xf32>
    %110 = vector.broadcast %109 : vector<1x64xf32> to vector<64x64xf32>
    %111 = arith.addf %108, %110 : vector<64x64xf32>
    %cst_166 = arith.constant 0.000000e+00 : f32
    %112 = vector.broadcast %cst_166 : f32 to vector<64x64xf32>
    %113 = arith.maximumf %111, %112 : vector<64x64xf32>
    %114 = tpu.concatenate %80, %113, %14 in 1 : vector<64x32xf32>, vector<64x64xf32>, vector<64x96xf32> -> vector<64x192xf32>
    %115 = vector.shape_cast %114 : vector<64x192xf32> to vector<1x8x8x192xf32>
    %c0_167 = arith.constant 0 : index
    %c0_168 = arith.constant 0 : index
    %c0_169 = arith.constant 0 : index
    %c0_170 = arith.constant 0 : index
    %116 = vector.load %arg14[%c0_167, %c0_168, %c0_169, %c0_170] : memref<1x8x8x192xf32, #tpu.memory_space<vmem>>, vector<1x8x8x192xf32>
    tpu.vector_store %arg14[%c0_167, %c0_168, %c0_169, %c0_170], %115 {strides = array<i32>} : memref<1x8x8x192xf32, #tpu.memory_space<vmem>>, vector<1x8x8x192xf32>,
    return
  }
  func.func @transform_0(%arg0: i32) -> (i32, i32, i32, i32) {
    %c0_i32 = arith.constant 0 : i32
    %c0_i32_0 = arith.constant 0 : i32
    %c0_i32_1 = arith.constant 0 : i32
    %c0_i32_2 = arith.constant 0 : i32
    return %arg0, %c0_i32, %c0_i32_0, %c0_i32_1 : i32, i32, i32, i32
  }
  func.func @transform_1(%arg0: i32) -> (i32, i32) {
    %c0_i32 = arith.constant 0 : i32
    %c0_i32_0 = arith.constant 0 : i32
    %c0_i32_1 = arith.constant 0 : i32
    return %c0_i32, %c0_i32_0 : i32, i32
  }
  func.func @transform_2(%arg0: i32) -> (i32, i32) {
    %c0_i32 = arith.constant 0 : i32
    %c0_i32_0 = arith.constant 0 : i32
    %c0_i32_1 = arith.constant 0 : i32
    return %c0_i32, %c0_i32_0 : i32, i32
  }
  func.func @transform_3(%arg0: i32) -> (i32, i32) {
    %c0_i32 = arith.constant 0 : i32
    %c0_i32_0 = arith.constant 0 : i32
    %c0_i32_1 = arith.constant 0 : i32
    return %c0_i32, %c0_i32_0 : i32, i32
  }
  func.func @transform_4(%arg0: i32) -> (i32, i32) {
    %c0_i32 = arith.constant 0 : i32
    %c0_i32_0 = arith.constant 0 : i32
    %c0_i32_1 = arith.constant 0 : i32
    return %c0_i32, %c0_i32_0 : i32, i32
  }
  func.func @transform_5(%arg0: i32) -> (i32, i32) {
    %c0_i32 = arith.constant 0 : i32
    %c0_i32_0 = arith.constant 0 : i32
    %c0_i32_1 = arith.constant 0 : i32
    return %c0_i32, %c0_i32_0 : i32, i32
  }
  func.func @transform_6(%arg0: i32) -> (i32, i32) {
    %c0_i32 = arith.constant 0 : i32
    %c0_i32_0 = arith.constant 0 : i32
    %c0_i32_1 = arith.constant 0 : i32
    return %c0_i32, %c0_i32_0 : i32, i32
  }
  func.func @transform_7(%arg0: i32) -> (i32, i32) {
    %c0_i32 = arith.constant 0 : i32
    %c0_i32_0 = arith.constant 0 : i32
    %c0_i32_1 = arith.constant 0 : i32
    return %c0_i32, %c0_i32_0 : i32, i32
  }
  func.func @transform_8(%arg0: i32) -> (i32, i32) {
    %c0_i32 = arith.constant 0 : i32
    %c0_i32_0 = arith.constant 0 : i32
    %c0_i32_1 = arith.constant 0 : i32
    return %c0_i32, %c0_i32_0 : i32, i32
  }
  func.func @transform_9(%arg0: i32) -> (i32, i32) {
    %c0_i32 = arith.constant 0 : i32
    %c0_i32_0 = arith.constant 0 : i32
    %c0_i32_1 = arith.constant 0 : i32
    return %c0_i32, %c0_i32_0 : i32, i32
  }
  func.func @transform_10(%arg0: i32) -> (i32, i32) {
    %c0_i32 = arith.constant 0 : i32
    %c0_i32_0 = arith.constant 0 : i32
    %c0_i32_1 = arith.constant 0 : i32
    return %c0_i32, %c0_i32_0 : i32, i32
  }
  func.func @transform_11(%arg0: i32) -> (i32, i32) {
    %c0_i32 = arith.constant 0 : i32
    %c0_i32_0 = arith.constant 0 : i32
    %c0_i32_1 = arith.constant 0 : i32
    return %c0_i32, %c0_i32_0 : i32, i32
  }
  func.func @transform_12(%arg0: i32) -> (i32, i32) {
    %c0_i32 = arith.constant 0 : i32
    %c0_i32_0 = arith.constant 0 : i32
    %c0_i32_1 = arith.constant 0 : i32
    return %c0_i32, %c0_i32_0 : i32, i32
  }
  func.func @transform_13(%arg0: i32) -> (i32, i32, i32, i32) {
    %c0_i32 = arith.constant 0 : i32
    %c0_i32_0 = arith.constant 0 : i32
    %c0_i32_1 = arith.constant 0 : i32
    %c0_i32_2 = arith.constant 0 : i32
    return %arg0, %c0_i32, %c0_i32_0, %c0_i32_1 : i32, i32, i32, i32
  }
}

</mosaic_0001>

<bundles_post_ra>
// kernel: inception3e_forward.1
= control target key start
LH: loop header
LB: loop body
LE: loop exit
PB: predicated region body
PF: predicated region fallthrough
CT: control target
= control target key end

     0   :  { %s4826_s0 = inlined_call_operand.vmem [shape: f32[2,8,8,192], index: 0, kind: input, shape index: {}]   ;;  %s4827_s1 = inlined_call_operand.vmem [shape: f32[192,128], index: 1, kind: input, shape index: {}]   ;;  %s4828_s2 = inlined_call_operand.vmem [shape: f32[1,128], index: 2, kind: input, shape index: {}]   ;;  %s4829_s3 = inlined_call_operand.vmem [shape: f32[1,128], index: 3, kind: input, shape index: {}]   ;;  %s4830_s4 = inlined_call_operand.vmem [shape: f32[144,32], index: 4, kind: input, shape index: {}]   ;;  %s4831_s5 = inlined_call_operand.vmem [shape: f32[1,32], index: 5, kind: input, shape index: {}]   ;;  %s4832_s6 = inlined_call_operand.vmem [shape: f32[1,32], index: 6, kind: input, shape index: {}]   ;;  %s4833_s7 = inlined_call_operand.vmem [shape: f32[288,32], index: 7, kind: input, shape index: {}]   ;;  %s4834_s8 = inlined_call_operand.vmem [shape: f32[1,32], index: 8, kind: input, shape index: {}]   ;;  %s4835_s9 = inlined_call_operand.vmem [shape: f32[1,32], index: 9, kind: input, shape index: {}]   ;;  %s4836_s10 = inlined_call_operand.vmem [shape: f32[144,64], index: 10, kind: input, shape index: {}]   ;;  %s4837_s11 = inlined_call_operand.vmem [shape: f32[1,64], index: 11, kind: input, shape index: {}]   ;;  %s4838_s12 = inlined_call_operand.vmem [shape: f32[1,64], index: 12, kind: input, shape index: {}]   ;;  %s4839_s13 = inlined_call_operand.hbm [shape: f32[2,8,8,192], index: 13, kind: output, shape index: {}]  }
   0x1   :  { %4852 = sst [smem:[#allocation10_spill]] %s4826_s0 }
   0x2   :  { %18 = vsyncpa [#allocation5], 0 }
   0x3   :  { %20 = vsyncpa [#allocation5 + $0x1], 0  ;;  %s3484_s25 = smov 0   ;;  %s3486_s26 = smov 0  }
   0x4   :  { %s3488_s27 = smov 0   ;;  %s3490_s28 = smov 0  }
   0x5 LB: > { %4853 = sst [smem:[#allocation7_spill]] %s3397_s27  ;;  %s3505_s29 = sadd.s32 4294967295, %s3401_s28   ;;  %s3401_s28 = sphi %s3490_s28, %s4864_s28   ;;  %s3397_s27 = sphi %s3488_s27, %s4866_s27   ;;  %s3393_s26 = sphi %s3486_s26, %s4868_s26   ;;  %s3389_s25 = sphi %s3484_s25, %s4867_s25  }
   0x6   : > { %s2633_s30 = sadd.s32 4294967294, %s3401_s28   ;;  %s3509_s14 = sadd.s32 1, %s3401_s28  }
   0x7   : > { %4854 = sst [smem:[#allocation8_spill]] %s3509_s14  ;;  %s311_s15 = sadd.s32 1, %s3397_s27 }
   0x8   : > { %s308_s16 = ssub.s32 %s3401_s28, %s3509_s14  ;;  %p321_p0 = scmp.ne.s32.totalorder %s3397_s27, %s3393_s26 }
   0x9   : > { %p309_p1 = scmp.eq.s32.totalorder %s308_s16, 0  ;;  %p322_p2 = scmp.eq.s32.totalorder %s3505_s29, 1 }
   0xa   : > { %p327_p3 = scmp.ne.s32.totalorder %s3393_s26, %s3389_s25  ;;  %p328_p4 = scmp.eq.s32.totalorder %s2633_s30, 1 }
   0xb   : > { %s3520_s17 = scalar_select %p309_p1, %s3397_s27, %s311_s15  }
   0xc   : > { %p3522_p5 = por %p322_p2, %p321_p0  ;;  %p3526_p6 = por %p328_p4, %p327_p3 }
   0xd   : > { %4855 = sst [smem:[#allocation9_spill]] %s3520_s17  ;;  %p2636_p7 = scmp.ge.s32.totalorder %s3401_s28, 1 }
   0xe   : > { %p390_p8 = scmp.lt.s32.totalorder %s3401_s28, 3 }
  0x10   : > { %p391_p9 = pnand %p2636_p7, %p390_p8 }
  0x11   : > { %v455_v0 = vld [vmem:[%s4827_s1] sm:$0xff] (!%p391_p9)  ;;  %v456_v1 = vld [vmem:[%s4827_s1 + $0x8] sm:$0xff] (!%p391_p9)  ;;  %v457_v2 = vld [vmem:[%s4827_s1 + $0x10] sm:$0xff] (!%p391_p9)  ;;  %p434_p10 = scmp.lt.s32.totalorder (!%p391_p9), %s3505_s29, 1  ;;  %v3403_v3 = vmov (!%p391_p9), 0.0|0.0   ;;  %s4858_s0 = sld [smem:[#allocation10_spill]] (!%p391_p9) }
  0x12   : > { %394 = sbr.rel (%p391_p9) target bundleno = 1084 (0x43c), region = 72  ;;  %2775 = vmatprep.subr.bf16.mxu0 (!%p391_p9), %v3403_v3  ;;  %v2776_v4 = vpack.c.bf16 (!%p391_p9), %v456_v1, %v455_v0  ;;  %v458_v5 = vld [vmem:[%s4827_s1 + $0x18] sm:$0xff] (!%p391_p9)  ;;  %2811 = vmatprep.subr.bf16.mxu1 (!%p391_p9), %v3403_v3  ;;  %v459_v7 = vld [vmem:[%s4827_s1 + $0x20] sm:$0xff] (!%p391_p9)  ;;  %v460_v8 = vld [vmem:[%s4827_s1 + $0x28] sm:$0xff] (!%p391_p9)  ;;  %vm479_vm0 = vcmask (!%p391_p9), 523264   ;;  %vm647_vm1 = vcmask (!%p391_p9), 130048  }
  0x13   : > { %v2779_v6 = vpack.c.bf16 (!%p391_p9), %v458_v5, %v457_v2  ;;  %v2782_v9 = vpack.c.bf16 (!%p391_p9), %v460_v8, %v459_v7  ;;  %v461_v10 = vld [vmem:[%s4827_s1 + $0x30] sm:$0xff] (!%p391_p9)  ;;  %v462_v11 = vld [vmem:[%s4827_s1 + $0x38] sm:$0xff] (!%p391_p9)  ;;  %v463_v14 = vld [vmem:[%s4827_s1 + $0x40] sm:$0xff] (!%p391_p9)  ;;  %vm649_vm2 = vcmask (!%p391_p9), 123904   ;;  %v3404_v53 = vmov (!%p391_p9), 0.0   ;;  %s4847_s21 = smov (!%p391_p9), 16  }
  0x14   : > { %2777 = vmatpush1.bf16.msra.mxu0 (!%p391_p9), %v2776_v4  ;;  %v2785_v13 = vpack.c.bf16 (!%p391_p9), %v462_v11, %v461_v10  ;;  %v464_v15 = vld [vmem:[%s4827_s1 + $0x48] sm:$0xff] (!%p391_p9)  ;;  %v465_v17 = vld [vmem:[%s4827_s1 + $0x50] sm:$0xff] (!%p391_p9)  ;;  %v466_v18 = vld [vmem:[%s4827_s1 + $0x58] sm:$0xff] (!%p391_p9)  ;;  %651 = vst.msk [vmem:[#allocation2 + $0x10] sm:$0xff] (!%p391_p9), %vm647_vm1, %v3404_v53  ;;  %vm983_vm3 = vcmask (!%p391_p9), 261120   ;;  %s4850_s22 = smov (!%p391_p9), 32  }
  0x15   : > { %2778 = vmatprep.subr.bf16.mxu0 (!%p391_p9), %v3403_v3  ;;  %v2788_v16 = vpack.c.bf16 (!%p391_p9), %v464_v15, %v463_v14  ;;  %v2791_v19 = vpack.c.bf16 (!%p391_p9), %v466_v18, %v465_v17  ;;  %v467_v20 = vld [vmem:[%s4827_s1 + $0x60] sm:$0xff] (!%p391_p9)  ;;  %v468_v21 = vld [vmem:[%s4827_s1 + $0x68] sm:$0xff] (!%p391_p9)  ;;  %v469_v23 = vld [vmem:[%s4827_s1 + $0x70] sm:$0xff] (!%p391_p9)  ;;  %652 = vst.msk [vmem:[#allocation2 + $0x18] sm:$0x3] (!%p391_p9), %vm649_vm2, %v3404_v53  ;;  %s3407_s27 = smov (!%p391_p9), 48  }
  0x16   : > { %v2794_v22 = vpack.c.bf16 (!%p391_p9), %v468_v21, %v467_v20  ;;  %v470_v24 = vld [vmem:[%s4827_s1 + $0x78] sm:$0xff] (!%p391_p9)  ;;  %v471_v26 = vld [vmem:[%s4827_s1 + $0x80] sm:$0xff] (!%p391_p9)  ;;  %v472_v27 = vld [vmem:[%s4827_s1 + $0x88] sm:$0xff] (!%p391_p9)  ;;  %648 = vst.msk [vmem:[#allocation2] sm:$0xff] (!%p391_p9), %vm647_vm1, %v3404_v53  ;;  %s3408_s17 = smov (!%p391_p9), 80   ;;  %s4845_s23 = smov (!%p391_p9), 96  }
  0x17   : > { %v2797_v25 = vpack.c.bf16 (!%p391_p9), %v470_v24, %v469_v23  ;;  %v2800_v28 = vpack.c.bf16 (!%p391_p9), %v472_v27, %v471_v26  ;;  %v473_v29 = vld [vmem:[%s4827_s1 + $0x90] sm:$0xff] (!%p391_p9)  ;;  %v474_v30 = vld [vmem:[%s4827_s1 + $0x98] sm:$0xff] (!%p391_p9)  ;;  %v475_v32 = vld [vmem:[%s4827_s1 + $0xa0] sm:$0xff] (!%p391_p9)  ;;  %650 = vst.msk [vmem:[#allocation2 + $0x8] sm:$0x3] (!%p391_p9), %vm649_vm2, %v3404_v53  ;;  %vm992_vm4 = vcmask (!%p391_p9), 392192  }
  0x18   : > { %2780 = vmatpush1.bf16.msra.mxu0 (!%p391_p9), %v2779_v6  ;;  %v2803_v31 = vpack.c.bf16 (!%p391_p9), %v474_v30, %v473_v29  ;;  %v476_v33 = vld [vmem:[%s4827_s1 + $0xa8] sm:$0xff] (!%p391_p9)  ;;  %v477_v35 = vld [vmem:[%s4827_s1 + $0xb0] sm:$0xff] (!%p391_p9)  ;;  %v478_v36 = vld [vmem:[%s4827_s1 + $0xb8] sm:$0xff] (!%p391_p9)  ;;  %653 = vst.msk [vmem:[#allocation2 + $0x20] sm:$0xff] (!%p391_p9), %vm647_vm1, %v3404_v53  ;;  %vm1009_vm5 = vcmask (!%p391_p9), 654336   ;;  %vm1018_vm6 = vcmask (!%p391_p9), 785408  }
  0x19   : > { %s435_s20 = scalar_select %p434_p10, %s3505_s29, 1  ;;  %2781 = vmatprep.subr.bf16.mxu0 %v3403_v3  ;;  %v2806_v34 = vpack.c.bf16 %v476_v33, %v475_v32  ;;  %v2809_v37 = vpack.c.bf16 %v478_v36, %v477_v35  ;;  %654 = vst.msk [vmem:[#allocation2 + $0x28] sm:$0x3] %vm649_vm2, %v3404_v53  ;;  %656 = vst.msk [vmem:[#allocation2 + $0x38] sm:$0x3] %vm649_vm2, %v3404_v53  ;;  %v1036_v56 = vld [vmem:[%s4830_s4] sm:$0xff] }
  0x1a   : > { %655 = vst.msk [vmem:[#allocation2 + $0x30] sm:$0xff] %vm647_vm1, %v3404_v53  ;;  %657 = vst.msk [vmem:[#allocation2 + $0x40] sm:$0xff] %vm647_vm1, %v3404_v53  ;;  %v1037_v57 = vld [vmem:[%s4830_s4 + $0x8] sm:$0xff]  ;;  %v1038_v58 = vld [vmem:[%s4830_s4 + $0x10] sm:$0xff]  ;;  %vm1027_vm7 = vcmask 916480   ;;  %vm1222_vm8 = vcmask 254976  }
  0x1b   : > { %s2685_s30 = sshll.u32 %s435_s20, 7  ;;  %658 = vst.msk [vmem:[#allocation2 + $0x48] sm:$0x3] %vm649_vm2, %v3404_v53  ;;  %660 = vst.msk [vmem:[#allocation2 + $0x58] sm:$0x3] %vm649_vm2, %v3404_v53  ;;  %v2812_v59 = vpack.c.bf16 %v1037_v57, %v1036_v56  ;;  %v1039_v60 = vld [vmem:[%s4830_s4 + $0x18] sm:$0xff] }
  0x1c   : > { %s3558_s15 = scalar_lea.vmem %s4858_s0, %s2685_s30  ;;  %2783 = vmatpush1.bf16.msra.mxu0 %v2782_v9  ;;  %659 = vst.msk [vmem:[#allocation2 + $0x50] sm:$0xff] %vm647_vm1, %v3404_v53  ;;  %661 = vst.msk [vmem:[#allocation2 + $0x60] sm:$0xff] %vm647_vm1, %v3404_v53  ;;  %v2815_v61 = vpack.c.bf16 %v1039_v60, %v1038_v58  ;;  %v1040_v63 = vld [vmem:[%s4830_s4 + $0x20] sm:$0xff]  ;;  %v1041_v0 = vld [vmem:[%s4830_s4 + $0x28] sm:$0xff]  ;;  %s4843_s20 = smov 112  }
  0x1d   : > { %v440_v12 = vld [vmem:[%s3558_s15 + $0x8] sm:$0xff]  ;;  %2784 = vmatprep.subr.bf16.mxu0 %v3403_v3  ;;  %v439_v38 = vld [vmem:[%s3558_s15] sm:$0xff]  ;;  %v442_v39 = vld [vmem:[%s3558_s15 + $0x18] sm:$0xff]  ;;  %662 = vst.msk [vmem:[#allocation2 + $0x68] sm:$0x3] %vm649_vm2, %v3404_v53  ;;  %2813 = vmatpush1.bf16.msra.mxu1 %v2812_v59  ;;  %v2818_v1 = vpack.c.bf16 %v1041_v0, %v1040_v63  ;;  %s431_s14 = sand.u32 1, %s3393_s26  }
  0x1e   : > { %2640 = vmatprep.mubr.msk.f32.mxu0 %vm479_vm0, %v440_v12  ;;  %v441_v40 = vld [vmem:[%s3558_s15 + $0x10] sm:$0xff]  ;;  %v444_v41 = vld [vmem:[%s3558_s15 + $0x28] sm:$0xff]  ;;  %v443_v42 = vld [vmem:[%s3558_s15 + $0x20] sm:$0xff]  ;;  %663 = vst.msk [vmem:[#allocation2 + $0x70] sm:$0xff] %vm647_vm1, %v3404_v53  ;;  %2814 = vmatprep.subr.bf16.mxu1 %v3403_v3  ;;  %s2637_s24 = sshll.u32 %s431_s14, 7 }
  0x1f   : > { %v446_v43 = vld [vmem:[%s3558_s15 + $0x38] sm:$0xff]  ;;  %v445_v44 = vld [vmem:[%s3558_s15 + $0x30] sm:$0xff]  ;;  %v448_v45 = vld [vmem:[%s3558_s15 + $0x48] sm:$0xff]  ;;  %664 = vst.msk [vmem:[#allocation2 + $0x78] sm:$0x3] %vm649_vm2, %v3404_v53 }
  0x20   : > { %2786 = vmatpush1.bf16.msra.mxu0 %v2785_v13  ;;  %v447_v46 = vld [vmem:[%s3558_s15 + $0x40] sm:$0xff]  ;;  %v450_v47 = vld [vmem:[%s3558_s15 + $0x58] sm:$0xff]  ;;  %v449_v48 = vld [vmem:[%s3558_s15 + $0x50] sm:$0xff]  ;;  %665 = vst.msk [vmem:[#allocation2 + $0x80] sm:$0xff] %vm647_vm1, %v3404_v53 }
  0x21   : > { %2787 = vmatprep.subr.bf16.mxu0 %v3403_v3  ;;  %v452_v49 = vld [vmem:[%s3558_s15 + $0x68] sm:$0xff]  ;;  %v451_v50 = vld [vmem:[%s3558_s15 + $0x60] sm:$0xff]  ;;  %v454_v51 = vld [vmem:[%s3558_s15 + $0x78] sm:$0xff]  ;;  %666 = vst.msk [vmem:[#allocation2 + $0x88] sm:$0x3] %vm649_vm2, %v3404_v53  ;;  %2816 = vmatpush1.bf16.msra.mxu1 %v2815_v61 }
  0x22   : > { %v453_v52 = vld [vmem:[%s3558_s15 + $0x70] sm:$0xff]  ;;  %667 = vst.msk [vmem:[#allocation2 + $0x90] sm:$0xff] %vm647_vm1, %v3404_v53  ;;  %v3688_v54 = vld [vmem:[#allocation2 + $0x1] sm:$0xff]  ;;  %2817 = vmatprep.subr.bf16.mxu1 %v3403_v3  ;;  %v1043_v4 = vld [vmem:[%s4830_s4 + $0x38] sm:$0xff]  ;;  %s4848_s15 = smov 64  }
  0x23   : > { %668 = vst.msk [vmem:[#allocation2 + $0x98] sm:$0x3] %vm649_vm2, %v3404_v53  ;;  %v3690_v55 = vld [vmem:[#allocation2 + $0x2] sm:$0xff]  ;;  %v1042_v2 = vld [vmem:[%s4830_s4 + $0x30] sm:$0xff]  ;;  %v3736_v9 = vld [vmem:[%s4828_s2] ss:$0 sm:$0xff] }
  0x24   : > { %2789 = vmatpush1.bf16.msra.mxu0 %v2788_v16  ;;  %1873 = vst.msk [vmem:[#allocation2 + $0x8] sm:$0x3] %vm649_vm2, %v3404_v53  ;;  %v3706_v62 = vld [vmem:[#allocation2] sm:$0xff]  ;;  %v2821_v5 = vpack.c.bf16 %v1043_v4, %v1042_v2  ;;  %v1045_v7 = vld [vmem:[%s4830_s4 + $0x48] sm:$0xff]  ;;  %v1046_v14 = vld [vmem:[%s4830_s4 + $0x50] sm:$0xff] }
  0x25   : > { %2790 = vmatprep.subr.bf16.mxu0 %v3403_v3  ;;  %1872 = vst.msk [vmem:[#allocation2] sm:$0xff] %vm647_vm1, %v3404_v53  ;;  %2819 = vmatpush1.bf16.msra.mxu1 %v2818_v1  ;;  %v1044_v6 = vld [vmem:[%s4830_s4 + $0x40] sm:$0xff]  ;;  %v1047_v15 = vld [vmem:[%s4830_s4 + $0x58] sm:$0xff]  ;;  %v1049_v23 = vld [vmem:[%s4830_s4 + $0x68] sm:$0xff] }
  0x26   : > { %2820 = vmatprep.subr.bf16.mxu1 %v3403_v3  ;;  %v2824_v8 = vpack.c.bf16 %v1045_v7, %v1044_v6  ;;  %v3741_v11 = vld [vmem:[%s4829_s3] ss:$0 sm:$0xff]  ;;  %v2827_v17 = vpack.c.bf16 %v1047_v15, %v1046_v14  ;;  %1221 = vst.msk [vmem:[#allocation3] sm:$0xff] %vm983_vm3, %v3404_v53  ;;  %1224 = vst.msk [vmem:[#allocation3 + $0x10] sm:$0xff] %vm983_vm3, %v3404_v53  ;;  %v1050_v30 = vld [vmem:[%s4830_s4 + $0x70] sm:$0xff] }
  0x27   : > { %1226 = vst.msk [vmem:[#allocation3 + $0x20] sm:$0xff] %vm983_vm3, %v3404_v53  ;;  %1228 = vst.msk [vmem:[#allocation3 + $0x30] sm:$0xff] %vm983_vm3, %v3404_v53 }
  0x28   : > { %2792 = vmatpush1.bf16.msra.mxu0 %v2791_v19  ;;  %1230 = vst.msk [vmem:[#allocation3 + $0x40] sm:$0xff] %vm983_vm3, %v3404_v53  ;;  %1232 = vst.msk [vmem:[#allocation3 + $0x50] sm:$0xff] %vm983_vm3, %v3404_v53 }
  0x29   : > { %2793 = vmatprep.subr.bf16.mxu0 %v3403_v3  ;;  %2822 = vmatpush1.bf16.msra.mxu1 %v2821_v5  ;;  %1234 = vst.msk [vmem:[#allocation3 + $0x60] sm:$0xff] %vm983_vm3, %v3404_v53  ;;  %1236 = vst.msk [vmem:[#allocation3 + $0x70] sm:$0xff] %vm983_vm3, %v3404_v53 }
  0x2a   : > { %2823 = vmatprep.subr.bf16.mxu1 %v3403_v3  ;;  %1238 = vst.msk [vmem:[#allocation3 + $0x80] sm:$0xff] %vm983_vm3, %v3404_v53  ;;  %1240 = vst.msk [vmem:[#allocation3 + $0x90] sm:$0xff] %vm983_vm3, %v3404_v53 }
  0x2b   : > { %1225 = vst.msk [vmem:[#allocation3 + $0x18] sm:$0x3] %vm1222_vm8, %v3404_v53  ;;  %1223 = vst.msk [vmem:[#allocation3 + $0x8] sm:$0x3] %vm1222_vm8, %v3404_v53 }
  0x2c   : > { %2795 = vmatpush1.bf16.msra.mxu0 %v2794_v22  ;;  %v1048_v22 = vld [vmem:[%s4830_s4 + $0x60] sm:$0xff]  ;;  %1227 = vst.msk [vmem:[#allocation3 + $0x28] sm:$0x3] %vm1222_vm8, %v3404_v53  ;;  %1229 = vst.msk [vmem:[#allocation3 + $0x38] sm:$0x3] %vm1222_vm8, %v3404_v53 }
  0x2d   : > { %2796 = vmatprep.subr.bf16.mxu0 %v3403_v3  ;;  %2825 = vmatpush1.bf16.msra.mxu1 %v2824_v8  ;;  %1231 = vst.msk [vmem:[#allocation3 + $0x48] sm:$0x3] %vm1222_vm8, %v3404_v53  ;;  %1233 = vst.msk [vmem:[#allocation3 + $0x58] sm:$0x3] %vm1222_vm8, %v3404_v53 }
  0x2e   : > { %2826 = vmatprep.subr.bf16.mxu1 %v3403_v3  ;;  %1235 = vst.msk [vmem:[#allocation3 + $0x68] sm:$0x3] %vm1222_vm8, %v3404_v53  ;;  %1237 = vst.msk [vmem:[#allocation3 + $0x78] sm:$0x3] %vm1222_vm8, %v3404_v53 }
  0x2f   : > { %1239 = vst.msk [vmem:[#allocation3 + $0x88] sm:$0x3] %vm1222_vm8, %v3404_v53  ;;  %1241 = vst.msk [vmem:[#allocation3 + $0x98] sm:$0x3] %vm1222_vm8, %v3404_v53 }
  0x30   : > { %2798 = vmatpush1.bf16.msra.mxu0 %v2797_v25  ;;  %v2830_v25 = vpack.c.bf16 %v1049_v23, %v1048_v22 }
  0x31   : > { %2799 = vmatprep.subr.bf16.mxu0 %v3403_v3  ;;  %2828 = vmatpush1.bf16.msra.mxu1 %v2827_v17 }
  0x32   : > { %2829 = vmatprep.subr.bf16.mxu1 %v3403_v3 }
  0x34   : > { %2801 = vmatpush1.bf16.msra.mxu0 %v2800_v28 }
  0x35   : > { %2802 = vmatprep.subr.bf16.mxu0 %v3403_v3  ;;  %2831 = vmatpush1.bf16.msra.mxu1 %v2830_v25 }
  0x36   : > { %2832 = vmatprep.subr.bf16.mxu1 %v3403_v3 }
  0x38   : > { %2804 = vmatpush1.bf16.msra.mxu0 %v2803_v31  ;;  %v1051_v31 = vld [vmem:[%s4830_s4 + $0x78] sm:$0xff] }
  0x39   : > { %2805 = vmatprep.subr.bf16.mxu0 %v3403_v3  ;;  %v2833_v33 = vpack.c.bf16 %v1051_v31, %v1050_v30 }
  0x3b   : > { %2834 = vmatpush1.bf16.msra.mxu1 %v2833_v33 }
  0x3c   : > { %2807 = vmatpush1.bf16.msra.mxu0 %v2806_v34  ;;  %2835 = vmatprep.subr.bf16.mxu1 %v3403_v3 }
  0x3d   : > { %2808 = vmatprep.subr.bf16.mxu0 %v3403_v3 }
  0x40   : > { %2810 = vmatpush1.bf16.msra.mxu0 %v2809_v37 }
  0x43   : > { %569 = vmatmul.mubr.f32.vlgmr.msra.gmra.mrb[0].mxu0 %v439_v38 }
  0x44   : > { %2641 = vmatprep.mubr.msk.f32.mxu0 %vm479_vm0, %v442_v39 }
  0x47   : > { %574 = vmatmul.mubr.f32.gmra.mrb[2].mxu0 %v441_v40 }
  0x48   : > { %2642 = vmatprep.mubr.msk.f32.mxu0 %vm479_vm0, %v444_v41 }
  0x4b   : > { %579 = vmatmul.mubr.f32.gmra.mrb[4].mxu0 %v443_v42 }
  0x4c   : > { %2643 = vmatprep.mubr.msk.f32.mxu0 %vm479_vm0, %v446_v43  ;;  %v1052_v43 = vld [vmem:[%s4830_s4 + $0x80] sm:$0xff] }
  0x4f   : > { %584 = vmatmul.mubr.f32.gmra.mrb[6].mxu0 %v445_v44  ;;  %v1053_v44 = vld [vmem:[%s4830_s4 + $0x88] sm:$0xff] }
  0x50   : > { %2644 = vmatprep.mubr.msk.f32.mxu0 %vm479_vm0, %v448_v45 }
  0x53   : > { %589 = vmatmul.mubr.f32.gmra.mrb[8].mxu0 %v447_v46  ;;  %v2836_v46 = vpack.c.bf16 %v1053_v44, %v1052_v43 }
  0x54   : > { %2645 = vmatprep.mubr.msk.f32.mxu0 %vm479_vm0, %v450_v47 }
  0x55   : > { %2837 = vmatpush1.bf16.msra.mxu1 %v2836_v46 }
  0x56   : > { %2878 = vmatprep.subr.bf16.mxu1 %v3403_v3 }
  0x57   : > { %594 = vmatmul.mubr.f32.gmra.mrb[10].mxu0 %v449_v48 }
  0x58   : > { %2646 = vmatprep.mubr.msk.f32.mxu0 %vm479_vm0, %v452_v49 }
  0x5b   : > { %599 = vmatmul.mubr.f32.gmra.mrb[12].mxu0 %v451_v50 }
  0x5c   : > { %2647 = vmatprep.mubr.msk.f32.mxu0 %vm479_vm0, %v454_v51 }
  0x5f   : > { %604 = vmatmul.mubr.f32.gmra.mrb[14].mxu0 %v453_v52 }
 0x116   : > { %v570_v10 = vpop.f32.mrb[0].mxu0 }
 0x117   : > { %v616_v12 = vmul.f32 %v3736_v9, %v570_v10  ;;  %v572_v13 = vpop.f32.mrb[1].mxu0 }
 0x119   : > { %v631_v16 = vadd.f32 %v3741_v11, %v616_v12 }
 0x11a   : > { %v575_v18 = vpop.f32.mrb[2].mxu0 }
 0x11b   : > { %v3751_v19 = vmax.f32 %v631_v16, 0.0  ;;  %v617_v20 = vmul.f32 %v3736_v9, %v575_v18  ;;  %v577_v21 = vpop.f32.mrb[3].mxu0 }
 0x11d   : > { %670 = vst.msk [vmem:[#allocation2 + $0x11] sm:$0xff] %vm647_vm1, %v3751_v19  ;;  %v632_v24 = vadd.f32 %v3741_v11, %v617_v20 }
 0x11e   : > { %v580_v26 = vpop.f32.mrb[4].mxu0 }
 0x11f   : > { %v3784_v27 = vmax.f32 %v632_v24, 0.0  ;;  %v618_v28 = vmul.f32 %v3736_v9, %v580_v26  ;;  %v582_v29 = vpop.f32.mrb[5].mxu0 }
 0x121   : > { %671 = vst.msk [vmem:[#allocation2 + $0x21] sm:$0xff] %vm647_vm1, %v3784_v27  ;;  %v633_v32 = vadd.f32 %v3741_v11, %v618_v28 }
 0x122   : > { %v585_v34 = vpop.f32.mrb[6].mxu0 }
 0x123   : > { %v3797_v35 = vmax.f32 %v633_v32, 0.0  ;;  %v619_v36 = vmul.f32 %v3736_v9, %v585_v34  ;;  %v587_v37 = vpop.f32.mrb[7].mxu0 }
 0x124   : > { %v687_v38 = vld [vmem:[#allocation2 + $0x11] sm:$0xff] }
 0x125   : > { %v695_v39 = vld [vmem:[#allocation2 + $0x12] sm:$0xff]  ;;  %672 = vst.msk [vmem:[#allocation2 + $0x31] sm:$0xff] %vm647_vm1, %v3797_v35  ;;  %v634_v41 = vadd.f32 %v3741_v11, %v619_v36  ;;  %v2954_v42 = vpack.i.bf16 %v687_v38, %v3688_v54 }
 0x126   : > { %v3800_v40 = vld [vmem:[#allocation2 + $0x10] sm:$0xff]  ;;  %1875 = vst.msk [vmem:[#allocation2 + $0x18] sm:$0x3] %vm649_vm2, %v3404_v53  ;;  %v590_v45 = vpop.f32.mrb[8].mxu0  ;;  %v2959_v56 = vpack.i.bf16 %v695_v39, %v3690_v55 }
 0x127   : > { %1874 = vst.msk [vmem:[#allocation2 + $0x10] sm:$0xff] %vm647_vm1, %v3404_v53  ;;  %v3817_v47 = vmax.f32 %v634_v41, 0.0  ;;  %2955 = vrot.lane.b32.xlu0 %v2954_v42, %s4847_s21  ;;  %v620_v48 = vmul.f32 %v3736_v9, %v590_v45  ;;  %v592_v49 = vpop.f32.mrb[9].mxu0 }
 0x128   : > { %v743_v50 = vld [vmem:[#allocation2 + $0x22] sm:$0xff] }
 0x129   : > { %v3821_v51 = vld [vmem:[#allocation2 + $0x20] sm:$0xff]  ;;  %673 = vst.msk [vmem:[#allocation2 + $0x41] sm:$0xff] %vm647_vm1, %v3817_v47  ;;  %2650 = vmatprep.mubr.msk.f32.mxu1 %vm647_vm1, %v743_v50  ;;  %v635_v54 = vadd.f32 %v3741_v11, %v620_v48  ;;  %v2974_v1 = vpack.i.bf16 %v743_v50, %v695_v39 }
 0x12a   : > { %v711_v52 = vld [vmem:[#allocation2 + $0x21] sm:$0xff]  ;;  %v2964_v57 = vpack.i.bf16 %v3821_v51, %v3800_v40  ;;  %v595_v58 = vpop.f32.mrb[10].mxu0 }
 0x12b   : > { %1877 = vst.msk [vmem:[#allocation2 + $0x28] sm:$0x3] %vm649_vm2, %v3404_v53  ;;  %v3835_v59 = vmax.f32 %v635_v54, 0.0  ;;  %2960 = vrot.lane.b32.xlu0 %v2959_v56, %s4850_s22  ;;  %v621_v55 = vmul.f32 %v3736_v9, %v595_v58  ;;  %v597_v60 = vpop.f32.mrb[11].mxu0  ;;  %v2969_v2 = vpack.i.bf16 %v711_v52, %v687_v38  ;;  %v742_v54 = vld [vmem:[#allocation2 + $0x91] sm:$0xff] }
 0x12c   : > { %1876 = vst.msk [vmem:[#allocation2 + $0x20] sm:$0xff] %vm647_vm1, %v3404_v53  ;;  %2965 = vrot.lane.b32.xlu1 %v2964_v57, %s3407_s27  ;;  %v736_v61 = vld [vmem:[#allocation2 + $0x31] sm:$0xff] }
 0x12d   : > { %v3840_v63 = vld [vmem:[#allocation2 + $0x30] sm:$0xff]  ;;  %674 = vst.msk [vmem:[#allocation2 + $0x51] sm:$0xff] %vm647_vm1, %v3835_v59  ;;  %v636_v4 = vadd.f32 %v3741_v11, %v621_v55  ;;  %v2984_v14 = vpack.i.bf16 %v736_v61, %v711_v52 }
 0x12e   : > { %v3842_v0 = vld [vmem:[#allocation2 + $0x32] sm:$0xff]  ;;  %v600_v5 = vpop.f32.mrb[12].mxu0  ;;  %v2979_v15 = vpack.i.bf16 %v3840_v63, %v3821_v51 }
 0x12f   : > { %1878 = vst.msk [vmem:[#allocation2 + $0x30] sm:$0xff] %vm647_vm1, %v3404_v53  ;;  %2975 = vrot.lane.b32.xlu0 %v2974_v1, %s3408_s17  ;;  %v3853_v6 = vmax.f32 %v636_v4, 0.0  ;;  %v622_v7 = vmul.f32 %v3736_v9, %v600_v5  ;;  %v602_v8 = vpop.f32.mrb[13].mxu0  ;;  %v2994_v25 = vpack.i.bf16 %v3842_v0, %v743_v50  ;;  %v734_v56 = vld [vmem:[#allocation2 + $0x90] sm:$0xff] }
 0x130   : > { %1879 = vst.msk [vmem:[#allocation2 + $0x38] sm:$0x3] %vm649_vm2, %v3404_v53  ;;  %2970 = vrot.lane.b32.xlu1 %v2969_v2, %s4848_s15  ;;  %v713_v10 = vld [vmem:[#allocation2 + $0x41] sm:$0xff]  ;;  %v3944_v57 = vld [vmem:[#allocation2 + $0x92] sm:$0xff] }
 0x131   : > { %v3856_v12 = vld [vmem:[#allocation2 + $0x40] sm:$0xff]  ;;  %675 = vst.msk [vmem:[#allocation2 + $0x61] sm:$0xff] %vm647_vm1, %v3853_v6  ;;  %v637_v16 = vadd.f32 %v3741_v11, %v622_v7  ;;  %v3004_v31 = vpack.i.bf16 %v713_v10, %v736_v61  ;;  %1890 = vst.msk [vmem:[#allocation2 + $0x90] sm:$0xff] %vm647_vm1, %v3404_v53 }
 0x132   : > { %v3858_v13 = vld [vmem:[#allocation2 + $0x42] sm:$0xff]  ;;  %v605_v17 = vpop.f32.mrb[14].mxu0  ;;  %1891 = vst.msk [vmem:[#allocation2 + $0x98] sm:$0x3] %vm649_vm2, %v3404_v53 }
 0x133   : > { %1881 = vst.msk [vmem:[#allocation2 + $0x48] sm:$0x3] %vm649_vm2, %v3404_v53  ;;  %2985 = vrot.lane.b32.xlu0 %v2984_v14, %s4843_s20  ;;  %v3871_v18 = vmax.f32 %v637_v16, 0.0  ;;  %v623_v20 = vmul.f32 %v3736_v9, %v605_v17  ;;  %v607_v21 = vpop.f32.mrb[15].mxu0  ;;  %v3009_v36 = vpack.i.bf16 %v3858_v13, %v3842_v0 }
 0x134   : > { %1880 = vst.msk [vmem:[#allocation2 + $0x40] sm:$0xff] %vm647_vm1, %v3404_v53  ;;  %2980 = vrot.lane.b32.xlu1 %v2979_v15, %s4845_s23  ;;  %v3874_v22 = vld [vmem:[#allocation2 + $0x50] sm:$0xff] }
 0x135   : > { %v738_v23 = vld [vmem:[#allocation2 + $0x51] sm:$0xff]  ;;  %676 = vst.msk [vmem:[#allocation2 + $0x71] sm:$0xff] %vm647_vm1, %v3871_v18  ;;  %v638_v26 = vadd.f32 %v3741_v11, %v623_v20  ;;  %v2999_v11 = vpack.i.bf16 %v3856_v12, %v3840_v63  ;;  %v3014_v37 = vpack.i.bf16 %v3874_v22, %v3856_v12 }
 0x136   : > { %v3876_v24 = vld [vmem:[#allocation2 + $0x52] sm:$0xff]  ;;  %v3019_v42 = vpack.i.bf16 %v738_v23, %v713_v10 }
 0x137   : > { %1882 = vst.msk [vmem:[#allocation2 + $0x50] sm:$0xff] %vm647_vm1, %v3404_v53  ;;  %2995 = vrot.lane.b32.xlu0 %v2994_v25, %s4850_s22  ;;  %v3888_v9 = vmax.f32 %v638_v26, 0.0  ;;  %v3029_v43 = vpack.i.bf16 %v3876_v24, %v3858_v13 }
 0x138   : > { %1883 = vst.msk [vmem:[#allocation2 + $0x58] sm:$0x3] %vm649_vm2, %v3404_v53  ;;  %2990 = vrot.lane.b32.xlu1 %v2984_v14, %s4847_s21  ;;  %v3890_v28 = vld [vmem:[#allocation2 + $0x60] sm:$0xff] }
 0x139   : > { %v715_v29 = vld [vmem:[#allocation2 + $0x61] sm:$0xff]  ;;  %677 = vst.msk [vmem:[#allocation2 + $0x81] sm:$0xff] %vm647_vm1, %v3888_v9  ;;  %v3034_v44 = vpack.i.bf16 %v3890_v28, %v3874_v22 }
 0x13a   : > { %v3892_v30 = vld [vmem:[#allocation2 + $0x62] sm:$0xff]  ;;  %v3039_v45 = vpack.i.bf16 %v715_v29, %v738_v23 }
 0x13b   : > { %1885 = vst.msk [vmem:[#allocation2 + $0x68] sm:$0x3] %vm649_vm2, %v3404_v53  ;;  %3005 = vrot.lane.b32.xlu0 %v3004_v31, %s4848_s15  ;;  %v3044_v46 = vpack.i.bf16 %v3892_v30, %v3876_v24 }
 0x13c   : > { %1884 = vst.msk [vmem:[#allocation2 + $0x60] sm:$0xff] %vm647_vm1, %v3404_v53  ;;  %3000 = vrot.lane.b32.xlu1 %v2999_v11, %s3407_s27  ;;  %v740_v32 = vld [vmem:[#allocation2 + $0x71] sm:$0xff] }
 0x13d   : > { %v3904_v33 = vld [vmem:[#allocation2 + $0x70] sm:$0xff]  ;;  %v3054_v48 = vpack.i.bf16 %v740_v32, %v715_v29 }
 0x13e   : > { %v3906_v34 = vld [vmem:[#allocation2 + $0x72] sm:$0xff]  ;;  %v3049_v49 = vpack.i.bf16 %v3904_v33, %v3890_v28 }
 0x13f   : > { %1886 = vst.msk [vmem:[#allocation2 + $0x70] sm:$0xff] %vm647_vm1, %v3404_v53  ;;  %3015 = vrot.lane.b32.xlu0 %v3014_v37, %s4845_s23  ;;  %v3064_v50 = vpack.i.bf16 %v3906_v34, %v3892_v30 }
 0x140   : > { %1887 = vst.msk [vmem:[#allocation2 + $0x78] sm:$0x3] %vm649_vm2, %v3404_v53  ;;  %3010 = vrot.lane.b32.xlu1 %v3009_v36, %s3408_s17  ;;  %v717_v38 = vld [vmem:[#allocation2 + $0x81] sm:$0xff] }
 0x141   : > { %v733_v39 = vld [vmem:[#allocation2 + $0x80] sm:$0xff]  ;;  %v3074_v52 = vpack.i.bf16 %v717_v38, %v740_v32 }
 0x142   : > { %v3918_v41 = vld [vmem:[#allocation2 + $0x82] sm:$0xff]  ;;  %v3069_v58 = vpack.i.bf16 %v733_v39, %v3904_v33 }
 0x143   : > { %1888 = vst.msk [vmem:[#allocation2 + $0x80] sm:$0xff] %vm647_vm1, %v3404_v53  ;;  %3025 = vrot.lane.b32.xlu0 %v3019_v42, %s4847_s21 }
 0x144   : > { %1889 = vst.msk [vmem:[#allocation2 + $0x88] sm:$0x3] %vm649_vm2, %v3404_v53  ;;  %3020 = vrot.lane.b32.xlu1 %v3019_v42, %s4843_s20 }
 0x147   : > { %3035 = vrot.lane.b32.xlu0 %v3034_v44, %s3407_s27 }
 0x148   : > { %3030 = vrot.lane.b32.xlu1 %v3029_v43, %s4850_s22 }
 0x14b   : > { %3045 = vrot.lane.b32.xlu0 %v3044_v46, %s3408_s17  ;;  %v2286_v46 = vld [vmem:[%s4836_s10 + $0x10] sm:$0xff] }
 0x14c   : > { %3040 = vrot.lane.b32.xlu1 %v3039_v45, %s4848_s15 }
 0x14f   : > { %3055 = vrot.lane.b32.xlu0 %v3054_v48, %s4843_s20 }
 0x150   : > { %3050 = vrot.lane.b32.xlu1 %v3049_v49, %s4845_s23 }
 0x153   : > { %3065 = vrot.lane.b32.xlu0 %v3064_v50, %s4850_s22 }
 0x154   : > { %3060 = vrot.lane.b32.xlu1 %v3054_v48, %s4847_s21  ;;  %v2287_v48 = vld [vmem:[%s4836_s10 + $0x18] sm:$0xff] }
 0x157   : > { %3075 = vrot.lane.b32.xlu0 %v3074_v52, %s4848_s15 }
 0x158   : > { %899 = vrot.lane.b32.xlu1 %v3906_v34, %s3408_s17 }
 0x15b   : > { %931 = vrot.lane.b32.xlu0 %v733_v39, %s4845_s23 }
 0x15c   : > { %3070 = vrot.lane.b32.xlu1 %v3069_v58, %s3407_s27 }
 0x15f   : > { %901 = vrot.lane.b32.xlu0 %v3918_v41, %s3408_s17 }
 0x160   : > { %963 = vrot.lane.b32.xlu1 %v717_v38, %s4843_s20 }
 0x163   : > { %965 = vrot.lane.b32.xlu0 %v742_v54, %s4843_s20 }
 0x164   : > { %933 = vrot.lane.b32.xlu1 %v734_v56, %s4845_s23  ;;  %s4860_s23 = smov 112  }
 0x167   : > { %1902 = vrot.lane.b32.xlu0 %v3784_v27, %s4843_s20 }
 0x168   : > { %1900 = vrot.lane.b32.xlu1 %v3751_v19, %s4843_s20 }
 0x16b   : > { %1906 = vrot.lane.b32.xlu0 %v3817_v47, %s4843_s20 }
 0x16c   : > { %1904 = vrot.lane.b32.xlu1 %v3797_v35, %s4843_s20 }
 0x16f   : > { %1910 = vrot.lane.b32.xlu0 %v3853_v6, %s4843_s20 }
 0x170   : > { %1908 = vrot.lane.b32.xlu1 %v3835_v59, %s4843_s20 }
 0x173   : > { %1914 = vrot.lane.b32.xlu0 %v3888_v9, %s4843_s20 }
 0x174   : > { %1912 = vrot.lane.b32.xlu1 %v3871_v18, %s4843_s20  ;;  %s4859_s20 = smov 96  }
 0x199   : > { %v2956_v55 = vpop.permute.xlu0 %2955 }
 0x19a   : > { %v2957_v60 = vunpack.i.l.bf16 %v2956_v55  ;;  %v2958_v61 = vunpack.i.h.bf16 %v2956_v55 }
 0x19c   : > { %v975_v7 = vsel %vm647_vm1, %v3706_v62, %v2957_v60  ;;  %v976_v14 = vsel %vm647_vm1, %v3800_v40, %v2958_v61  ;;  %v2284_v62 = vld [vmem:[%s4836_s10] sm:$0xff]  ;;  %v2285_v40 = vld [vmem:[%s4836_s10 + $0x8] sm:$0xff]  ;;  %v2882_v61 = vpack.c.bf16 %v2287_v48, %v2286_v46 }
 0x19d   : > { %v2961_v1 = vpop.permute.xlu0 %2960  ;;  %v2879_v44 = vpack.c.bf16 %v2285_v40, %v2284_v62 }
 0x19e   : > { %v2966_v2 = vpop.permute.xlu1 %2965  ;;  %v2963_v4 = vunpack.i.h.bf16 %v2961_v1  ;;  %v2962_v5 = vunpack.i.l.bf16 %v2961_v1 }
 0x19f   : > { %v2967_v8 = vunpack.i.l.bf16 %v2966_v2  ;;  %v2968_v15 = vunpack.i.h.bf16 %v2966_v2 }
 0x1a0   : > { %v984_v10 = vsel %vm983_vm3, %v975_v7, %v2962_v5  ;;  %v985_v20 = vsel %vm983_vm3, %v976_v14, %v2963_v4  ;;  %v2288_v4 = vld [vmem:[%s4836_s10 + $0x20] sm:$0xff]  ;;  %v2289_v5 = vld [vmem:[%s4836_s10 + $0x28] sm:$0xff] }
 0x1a1   : > { %v2976_v16 = vpop.permute.xlu0 %2975  ;;  %v993_v25 = vsel %vm992_vm4, %v984_v10, %v2967_v8  ;;  %v994_v31 = vsel %vm992_vm4, %v985_v20, %v2968_v15  ;;  %v2291_v20 = vld [vmem:[%s4836_s10 + $0x38] sm:$0xff] }
 0x1a2   : > { %v2971_v17 = vpop.permute.xlu1 %2970  ;;  %v2977_v26 = vunpack.i.l.bf16 %v2976_v16  ;;  %v2978_v11 = vunpack.i.h.bf16 %v2976_v16  ;;  %v2885_v16 = vpack.c.bf16 %v2289_v5, %v2288_v4 }
 0x1a3   : > { %v2973_v21 = vunpack.i.h.bf16 %v2971_v17  ;;  %v2972_v23 = vunpack.i.l.bf16 %v2971_v17  ;;  %v2290_v17 = vld [vmem:[%s4836_s10 + $0x30] sm:$0xff] }
 0x1a4   : > { %v2888_v62 = vpack.c.bf16 %v2291_v20, %v2290_v17 }
 0x1a5   : > { %v1001_v29 = vsel %vm479_vm0, %v993_v25, %v2972_v23  ;;  %v2986_v32 = vpop.permute.xlu0 %2985  ;;  %v1002_v37 = vsel %vm479_vm0, %v994_v31, %v2973_v21 }
 0x1a6   : > { %v2981_v36 = vpop.permute.xlu1 %2980  ;;  %v2987_v38 = vunpack.i.l.bf16 %v2986_v32  ;;  %v1010_v43 = vsel %vm1009_vm5, %v1001_v29, %v2977_v26  ;;  %v2988_v49 = vunpack.i.h.bf16 %v2986_v32  ;;  %v1011_v56 = vsel %vm1009_vm5, %v1002_v37, %v2978_v11 }
 0x1a7   : > { %v2983_v39 = vunpack.i.h.bf16 %v2981_v36  ;;  %v2982_v42 = vunpack.i.l.bf16 %v2981_v36  ;;  %v2293_v36 = vld [vmem:[%s4836_s10 + $0x48] sm:$0xff] }
 0x1a9   : > { %v1019_v45 = vsel %vm1018_vm6, %v1010_v43, %v2982_v42  ;;  %v2996_v50 = vpop.permute.xlu0 %2995  ;;  %v1020_v55 = vsel %vm1018_vm6, %v1011_v56, %v2983_v39 }
 0x1aa   : > { %v2991_v52 = vpop.permute.xlu1 %2990  ;;  %v1028_v54 = vsel %vm1027_vm7, %v1019_v45, %v2987_v38  ;;  %v2997_v60 = vunpack.i.l.bf16 %v2996_v50  ;;  %v2998_v14 = vunpack.i.h.bf16 %v2996_v50 }
 0x1ab   : > { %v2992_v58 = vunpack.i.l.bf16 %v2991_v52  ;;  %1143 = vmatmul.mubr.f32.vlgmr.msra.gmra.mrb[0].mxu1 %v1028_v54  ;;  %v2993_v1 = vunpack.i.h.bf16 %v2991_v52 }
 0x1ac   : > { %2651 = vmatprep.mubr.msk.f32.mxu1 %vm647_vm1, %v3842_v0  ;;  %2880 = vmatpush1.bf16.msra.mxu1 %v2879_v44  ;;  %v1029_v0 = vsel %vm1027_vm7, %v1020_v55, %v2988_v49 }
 0x1ad   : > { %v977_v2 = vsel %vm647_vm1, %v3821_v51, %v2992_v58  ;;  %2881 = vmatprep.subr.bf16.mxu1 %v3403_v3  ;;  %v3006_v7 = vpop.permute.xlu0 %3005  ;;  %v978_v21 = vsel %vm647_vm1, %v3840_v63, %v2993_v1  ;;  %v2292_v63 = vld [vmem:[%s4836_s10 + $0x40] sm:$0xff] }
 0x1ae   : > { %v3001_v8 = vpop.permute.xlu1 %3000  ;;  %v3007_v15 = vunpack.i.l.bf16 %v3006_v7  ;;  %v986_v51 = vsel %vm983_vm3, %v977_v2, %v2997_v60  ;;  %v3008_v40 = vunpack.i.h.bf16 %v3006_v7  ;;  %v987_v31 = vsel %vm983_vm3, %v978_v21, %v2998_v14 }
 0x1af   : > { %v3002_v10 = vunpack.i.l.bf16 %v3001_v8  ;;  %1148 = vmatmul.mubr.f32.gmra.mrb[2].mxu1 %v1029_v0  ;;  %v3003_v23 = vunpack.i.h.bf16 %v3001_v8  ;;  %v2891_v45 = vpack.c.bf16 %v2293_v36, %v2292_v63 }
 0x1b0   : > { %2652 = vmatprep.mubr.msk.f32.mxu1 %vm647_vm1, %v3858_v13  ;;  %2883 = vmatpush1.bf16.msra.mxu1 %v2882_v61 }
 0x1b1   : > { %v995_v25 = vsel %vm992_vm4, %v986_v51, %v3002_v10  ;;  %2884 = vmatprep.subr.bf16.mxu1 %v3403_v3  ;;  %v3016_v13 = vpop.permute.xlu0 %3015  ;;  %v996_v37 = vsel %vm992_vm4, %v987_v31, %v3003_v23 }
 0x1b2   : > { %v3011_v26 = vpop.permute.xlu1 %3010  ;;  %v3017_v11 = vunpack.i.l.bf16 %v3016_v13  ;;  %v1003_v32 = vsel %vm479_vm0, %v995_v25, %v3007_v15  ;;  %v3018_v46 = vunpack.i.h.bf16 %v3016_v13  ;;  %v1004_v50 = vsel %vm479_vm0, %v996_v37, %v3008_v40 }
 0x1b3   : > { %v3012_v29 = vunpack.i.l.bf16 %v3011_v26  ;;  %v3013_v38 = vunpack.i.h.bf16 %v3011_v26 }
 0x1b4   : > { %2886 = vmatpush1.bf16.msra.mxu1 %v2885_v16 }
 0x1b5   : > { %v1012_v39 = vsel %vm1009_vm5, %v1003_v32, %v3012_v29  ;;  %2887 = vmatprep.subr.bf16.mxu1 %v3403_v3  ;;  %v3026_v43 = vpop.permute.xlu0 %3025  ;;  %v1013_v56 = vsel %vm1009_vm5, %v1004_v50, %v3013_v38 }
 0x1b6   : > { %v3021_v42 = vpop.permute.xlu1 %3020  ;;  %v3027_v48 = vunpack.i.l.bf16 %v3026_v43  ;;  %v1021_v49 = vsel %vm1018_vm6, %v1012_v39, %v3017_v11  ;;  %v3028_v58 = vunpack.i.h.bf16 %v3026_v43  ;;  %v1022_v5 = vsel %vm1018_vm6, %v1013_v56, %v3018_v46 }
 0x1b7   : > { %v3022_v44 = vunpack.i.l.bf16 %v3021_v42  ;;  %v3023_v52 = vunpack.i.h.bf16 %v3021_v42 }
 0x1b8   : > { %2889 = vmatpush1.bf16.msra.mxu1 %v2888_v62  ;;  %v979_v2 = vsel %vm647_vm1, %v3856_v12, %v3027_v48  ;;  %v980_v0 = vsel %vm647_vm1, %v3874_v22, %v3028_v58 }
 0x1b9   : > { %v1030_v54 = vsel %vm1027_vm7, %v1021_v49, %v3022_v44  ;;  %2890 = vmatprep.subr.bf16.mxu1 %v3403_v3  ;;  %v3036_v60 = vpop.permute.xlu0 %3035  ;;  %v1031_v8 = vsel %vm1027_vm7, %v1022_v5, %v3023_v52 }
 0x1ba   : > { %1153 = vmatmul.mubr.f32.gmra.mrb[4].mxu1 %v1030_v54  ;;  %v3031_v55 = vpop.permute.xlu1 %3030  ;;  %v3037_v4 = vunpack.i.l.bf16 %v3036_v60  ;;  %v3038_v10 = vunpack.i.h.bf16 %v3036_v60 }
 0x1bb   : > { %v3033_v61 = vunpack.i.h.bf16 %v3031_v55  ;;  %v3032_v1 = vunpack.i.l.bf16 %v3031_v55  ;;  %2653 = vmatprep.mubr.msk.f32.mxu1 %vm647_vm1, %v3876_v24 }
 0x1bc   : > { %2892 = vmatpush1.bf16.msra.mxu1 %v2891_v45 }
 0x1bd   : > { %v988_v7 = vsel %vm983_vm3, %v979_v2, %v3032_v1  ;;  %2893 = vmatprep.subr.bf16.mxu1 %v3403_v3  ;;  %v3046_v24 = vpop.permute.xlu0 %3045  ;;  %v989_v15 = vsel %vm983_vm3, %v980_v0, %v3033_v61 }
 0x1be   : > { %1158 = vmatmul.mubr.f32.gmra.mrb[6].mxu1 %v1031_v8  ;;  %v3041_v14 = vpop.permute.xlu1 %3040  ;;  %v997_v16 = vsel %vm992_vm4, %v988_v7, %v3037_v4  ;;  %v3047_v17 = vunpack.i.l.bf16 %v3046_v24  ;;  %v998_v21 = vsel %vm992_vm4, %v989_v15, %v3038_v10  ;;  %v3048_v23 = vunpack.i.h.bf16 %v3046_v24  ;;  %v2294_v24 = vld [vmem:[%s4836_s10 + $0x50] sm:$0xff]  ;;  %v2295_v15 = vld [vmem:[%s4836_s10 + $0x58] sm:$0xff] }
 0x1bf   : > { %v3043_v12 = vunpack.i.h.bf16 %v3041_v14  ;;  %v3042_v51 = vunpack.i.l.bf16 %v3041_v14  ;;  %2654 = vmatprep.mubr.msk.f32.mxu1 %vm647_vm1, %v3892_v30 }
 0x1c1   : > { %v1005_v20 = vsel %vm479_vm0, %v997_v16, %v3042_v51  ;;  %v3056_v22 = vpop.permute.xlu0 %3055  ;;  %v1006_v26 = vsel %vm479_vm0, %v998_v21, %v3043_v12  ;;  %v2894_v51 = vpack.c.bf16 %v2295_v15, %v2294_v24 }
 0x1c2   : > { %v3051_v25 = vpop.permute.xlu1 %3050  ;;  %v3057_v13 = vunpack.i.l.bf16 %v3056_v22  ;;  %v1014_v40 = vsel %vm1009_vm5, %v1005_v20, %v3047_v17  ;;  %v3058_v30 = vunpack.i.h.bf16 %v3056_v22  ;;  %v1015_v36 = vsel %vm1009_vm5, %v1006_v26, %v3048_v23  ;;  %v2297_v20 = vld [vmem:[%s4836_s10 + $0x68] sm:$0xff]  ;;  %v2299_v26 = vld [vmem:[%s4836_s10 + $0x78] sm:$0xff] }
 0x1c3   : > { %v3053_v29 = vunpack.i.h.bf16 %v3051_v25  ;;  %v3052_v62 = vunpack.i.l.bf16 %v3051_v25  ;;  %2895 = vmatpush1.bf16.msra.mxu1 %v2894_v51  ;;  %v2298_v25 = vld [vmem:[%s4836_s10 + $0x70] sm:$0xff] }
 0x1c4   : > { %2896 = vmatprep.subr.bf16.mxu1 %v3403_v3 }
 0x1c5   : > { %v1023_v31 = vsel %vm1018_vm6, %v1014_v40, %v3052_v62  ;;  %v3066_v11 = vpop.permute.xlu0 %3065  ;;  %v1024_v37 = vsel %vm1018_vm6, %v1015_v36, %v3053_v29  ;;  %v1940_v29 = vld [vmem:[#allocation2 + $0x1] sm:$0xff]  ;;  %v2900_v62 = vpack.c.bf16 %v2299_v26, %v2298_v25 }
 0x1c6   : > { %v3061_v32 = vpop.permute.xlu1 %3060  ;;  %v1032_v63 = vsel %vm1027_vm7, %v1023_v31, %v3057_v13  ;;  %v1033_v44 = vsel %vm1027_vm7, %v1024_v37, %v3058_v30  ;;  %v3068_v45 = vunpack.i.h.bf16 %v3066_v11  ;;  %v3067_v46 = vunpack.i.l.bf16 %v3066_v11  ;;  %v1948_v13 = vld [vmem:[#allocation2 + $0x2] sm:$0xff] }
 0x1c7   : > { %1163 = vmatmul.mubr.f32.gmra.mrb[8].mxu1 %v1032_v63  ;;  %v3063_v38 = vunpack.i.h.bf16 %v3061_v32  ;;  %v3062_v39 = vunpack.i.l.bf16 %v3061_v32 }
 0x1c8   : > { %2655 = vmatprep.mubr.msk.f32.mxu1 %vm647_vm1, %v3906_v34 }
 0x1c9   : > { %v3076_v43 = vpop.permute.xlu0 %3075  ;;  %v981_v48 = vsel %vm647_vm1, %v3890_v28, %v3062_v39  ;;  %v982_v49 = vsel %vm647_vm1, %v3904_v33, %v3063_v38 }
 0x1ca   : > { %v900_v42 = vpop.permute.xlu1 %899  ;;  %v3077_v56 = vunpack.i.l.bf16 %v3076_v43  ;;  %v990_v58 = vsel %vm983_vm3, %v981_v48, %v3067_v46  ;;  %v991_v55 = vsel %vm983_vm3, %v982_v49, %v3068_v45  ;;  %v3078_v60 = vunpack.i.h.bf16 %v3076_v43  ;;  %v2301_v43 = vld [vmem:[%s4836_s10 + $0x88] sm:$0xff] }
 0x1cb   : > { %1168 = vmatmul.mubr.f32.gmra.mrb[10].mxu1 %v1033_v44 }
 0x1cc   : > { %2656 = vmatprep.mubr.msk.f32.mxu1 %vm647_vm1, %v3918_v41 }
 0x1cd   : > { %v932_v50 = vpop.permute.xlu0 %931 }
 0x1ce   : > { %v3071_v34 = vpop.permute.xlu1 %3070 }
 0x1cf   : > { %v3073_v52 = vunpack.i.h.bf16 %v3071_v34  ;;  %v3072_v54 = vunpack.i.l.bf16 %v3071_v34 }
 0x1d1   : > { %v999_v61 = vsel %vm992_vm4, %v990_v58, %v3072_v54  ;;  %v1000_v41 = vsel %vm992_vm4, %v991_v55, %v3073_v52  ;;  %v902_v1 = vpop.permute.xlu0 %901 }
 0x1d2   : > { %v964_v2 = vpop.permute.xlu1 %963  ;;  %v1007_v28 = vsel %vm479_vm0, %v999_v61, %v3077_v56  ;;  %v1008_v33 = vsel %vm479_vm0, %v1000_v41, %v3078_v60 }
 0x1d3   : > { %v1016_v4 = vsel %vm1009_vm5, %v1007_v28, %v900_v42  ;;  %v1017_v8 = vsel %vm1009_vm5, %v1008_v33, %v902_v1  ;;  %v2300_v42 = vld [vmem:[%s4836_s10 + $0x80] sm:$0xff] }
 0x1d4   : > { %v1025_v5 = vsel %vm1018_vm6, %v1016_v4, %v932_v50  ;;  %v2903_v44 = vpack.c.bf16 %v2301_v43, %v2300_v42  ;;  %v1583_v42 = vld [vmem:[%s4833_s7 + $0x98] sm:$0xff] }
 0x1d5   : > { %v1034_v7 = vsel %vm1027_vm7, %v1025_v5, %v964_v2  ;;  %v966_v0 = vpop.permute.xlu0 %965 }
 0x1d6   : > { %v934_v10 = vpop.permute.xlu1 %933  ;;  %1173 = vmatmul.mubr.f32.gmra.mrb[12].mxu1 %v1034_v7 }
 0x1d7   : > { %v1026_v14 = vsel %vm1018_vm6, %v1017_v8, %v934_v10  ;;  %2657 = vmatprep.mubr.msk.f32.mxu1 %vm647_vm1, %v3944_v57  ;;  %v2296_v57 = vld [vmem:[%s4836_s10 + $0x60] sm:$0xff] }
 0x1d8   : > { %v1035_v12 = vsel %vm1027_vm7, %v1026_v14, %v966_v0  ;;  %v2897_v21 = vpack.c.bf16 %v2297_v20, %v2296_v57 }
 0x1d9   : > { %v1903_v16 = vpop.permute.xlu0 %1902 }
 0x1da   : > { %v1901_v17 = vpop.permute.xlu1 %1900  ;;  %1178 = vmatmul.mubr.f32.gmra.mrb[14].mxu1 %v1035_v12  ;;  %1925 = vst.msk [vmem:[#allocation2 + $0x21] sm:$0xff] %vm647_vm1, %v1903_v16 }
 0x1db   : > { %1924 = vst.msk [vmem:[#allocation2 + $0x11] sm:$0xff] %vm647_vm1, %v1901_v17  ;;  %2898 = vmatpush1.bf16.msra.mxu1 %v2897_v21 }
 0x1dc   : > { %2899 = vmatprep.subr.bf16.mxu1 %v3403_v3 }
 0x1dd   : > { %v1907_v23 = vpop.permute.xlu0 %1906 }
 0x1de   : > { %v1905_v22 = vpop.permute.xlu1 %1904  ;;  %1927 = vst.msk [vmem:[#allocation2 + $0x41] sm:$0xff] %vm647_vm1, %v1907_v23 }
 0x1df   : > { %1926 = vst.msk [vmem:[#allocation2 + $0x31] sm:$0xff] %vm647_vm1, %v1905_v22  ;;  %2901 = vmatpush1.bf16.msra.mxu1 %v2900_v62  ;;  %v1995_v62 = vld [vmem:[#allocation2 + $0x91] sm:$0xff] }
 0x1e0   : > { %2902 = vmatprep.subr.bf16.mxu1 %v3403_v3 }
 0x1e1   : > { %v1911_v40 = vpop.permute.xlu0 %1910  ;;  %v1996_v30 = vld [vmem:[#allocation2 + $0x22] sm:$0xff] }
 0x1e2   : > { %v1909_v31 = vpop.permute.xlu1 %1908  ;;  %v1949_v11 = vld [vmem:[#allocation2 + $0x12] sm:$0xff]  ;;  %1929 = vst.msk [vmem:[#allocation2 + $0x61] sm:$0xff] %vm647_vm1, %v1911_v40  ;;  %2670 = vmatprep.mubr.msk.f32.mxu1 %vm647_vm1, %v1996_v30  ;;  %v1965_v37 = vld [vmem:[#allocation2 + $0x21] sm:$0xff] }
 0x1e3   : > { %v1941_v32 = vld [vmem:[#allocation2 + $0x11] sm:$0xff]  ;;  %1928 = vst.msk [vmem:[#allocation2 + $0x51] sm:$0xff] %vm647_vm1, %v1909_v31  ;;  %v3084_v63 = vpack.i.bf16 %v1949_v11, %v1948_v13  ;;  %v4119_v39 = vld [vmem:[#allocation2 + $0x20] sm:$0xff]  ;;  %2904 = vmatpush1.bf16.msra.mxu1 %v2903_v44  ;;  %v3099_v50 = vpack.i.bf16 %v1996_v30, %v1949_v11  ;;  %v1581_v11 = vld [vmem:[%s4833_s7 + $0x88] sm:$0xff] }
 0x1e4   : > { %v3079_v36 = vpack.i.bf16 %v1941_v32, %v1940_v29  ;;  %v4117_v38 = vld [vmem:[#allocation2 + $0x10] sm:$0xff]  ;;  %v3094_v3 = vpack.i.bf16 %v1965_v37, %v1941_v32  ;;  %v1564_v32 = vld [vmem:[%s4833_s7] sm:$0xff] }
 0x1e5   : > { %3085 = vrot.lane.b32.xlu0 %v3084_v63, %s4850_s22  ;;  %v1915_v45 = vpop.permute.xlu0 %1914  ;;  %v3089_v48 = vpack.i.bf16 %v4119_v39, %v4117_v38  ;;  %v4144_v58 = vld [vmem:[#allocation2 + $0x40] sm:$0xff]  ;;  %v1987_v29 = vld [vmem:[#allocation2 + $0x90] sm:$0xff] }
 0x1e6   : > { %3080 = vrot.lane.b32.xlu1 %v3079_v36, %s4847_s21  ;;  %v1913_v46 = vpop.permute.xlu1 %1912  ;;  %1931 = vst.msk [vmem:[#allocation2 + $0x81] sm:$0xff] %vm647_vm1, %v1915_v45  ;;  %v4134_v49 = vld [vmem:[#allocation2 + $0x30] sm:$0xff]  ;;  %v1967_v61 = vld [vmem:[#allocation2 + $0x41] sm:$0xff] }
 0x1e7   : > { %1930 = vst.msk [vmem:[#allocation2 + $0x71] sm:$0xff] %vm647_vm1, %v1913_v46  ;;  %v3104_v34 = vpack.i.bf16 %v4134_v49, %v4119_v39  ;;  %v1989_v52 = vld [vmem:[#allocation2 + $0x31] sm:$0xff]  ;;  %v3124_v60 = vpack.i.bf16 %v4144_v58, %v4134_v49  ;;  %v4151_v41 = vld [vmem:[#allocation2 + $0x42] sm:$0xff] }
 0x1e8   : > { %v3109_v54 = vpack.i.bf16 %v1989_v52, %v1965_v37  ;;  %v4142_v56 = vld [vmem:[#allocation2 + $0x32] sm:$0xff]  ;;  %v3129_v1 = vpack.i.bf16 %v1967_v61, %v1989_v52  ;;  %v1565_v36 = vld [vmem:[%s4833_s7 + $0x8] sm:$0xff]  ;;  %v1932_v52 = vld [vmem:[#allocation2] sm:$0xff] }
 0x1e9   : > { %3095 = vrot.lane.b32.xlu0 %v3094_v3, %s4848_s15  ;;  %v3119_v55 = vpack.i.bf16 %v4142_v56, %v1996_v30  ;;  %v3134_v2 = vpack.i.bf16 %v4151_v41, %v4142_v56  ;;  %v1969_v0 = vld [vmem:[#allocation2 + $0x61] sm:$0xff]  ;;  %v1582_v37 = vld [vmem:[%s4833_s7 + $0x90] sm:$0xff]  ;;  %v2840_v43 = vpack.c.bf16 %v1565_v36, %v1564_v32  ;;  %v1567_v46 = vld [vmem:[%s4833_s7 + $0x18] sm:$0xff] }
 0x1ea   : > { %3090 = vrot.lane.b32.xlu1 %v3089_v48, %s3407_s27  ;;  %v1991_v28 = vld [vmem:[#allocation2 + $0x51] sm:$0xff]  ;;  %v4169_v10 = vld [vmem:[#allocation2 + $0x60] sm:$0xff]  ;;  %v2842_v44 = vpack.c.bf16 %v1583_v42, %v1582_v37  ;;  %v1585_v48 = vld [vmem:[%s4833_s7 + $0xa8] sm:$0xff] }
 0x1eb   : > { %v4157_v33 = vld [vmem:[#allocation2 + $0x50] sm:$0xff]  ;;  %v3144_v4 = vpack.i.bf16 %v1991_v28, %v1967_v61  ;;  %v3164_v14 = vpack.i.bf16 %v1969_v0, %v1991_v28  ;;  %v4175_v15 = vld [vmem:[#allocation2 + $0x62] sm:$0xff]  ;;  %v1587_v28 = vld [vmem:[%s4833_s7 + $0xb8] sm:$0xff] }
 0x1ec   : > { %v3139_v5 = vpack.i.bf16 %v4157_v33, %v4144_v58  ;;  %v4163_v7 = vld [vmem:[#allocation2 + $0x52] sm:$0xff]  ;;  %v3159_v24 = vpack.i.bf16 %v4169_v10, %v4157_v33  ;;  %v1580_v30 = vld [vmem:[%s4833_s7 + $0x80] sm:$0xff]  ;;  %v1569_v61 = vld [vmem:[%s4833_s7 + $0x28] sm:$0xff] }
 0x1ed   : > { %3105 = vrot.lane.b32.xlu0 %v3104_v34, %s4859_s20  ;;  %v3154_v8 = vpack.i.bf16 %v4163_v7, %v4151_v41  ;;  %v3169_v51 = vpack.i.bf16 %v4175_v15, %v4163_v7  ;;  %v1963_v21 = vld [vmem:[#allocation2 + $0x80] sm:$0xff]  ;;  %v2838_v63 = vpack.c.bf16 %v1581_v11, %v1580_v30  ;;  %v1566_v45 = vld [vmem:[%s4833_s7 + $0x10] sm:$0xff]  ;;  %v1591_v37 = vld [vmem:[%s4833_s7 + $0xd8] sm:$0xff] }
 0x1ee   : > { %3100 = vrot.lane.b32.xlu1 %v3099_v50, %s3408_s17  ;;  %v4177_v12 = vld [vmem:[#allocation2 + $0x70] sm:$0xff]  ;;  %v1971_v22 = vld [vmem:[#allocation2 + $0x81] sm:$0xff]  ;;  %v3209_v40 = vpack.i.bf16 %v1987_v29, %v1963_v21  ;;  %v2844_v50 = vpack.c.bf16 %v1567_v46, %v1566_v45 }
 0x1ef   : > { %v3174_v16 = vpack.i.bf16 %v4177_v12, %v4169_v10  ;;  %v1993_v17 = vld [vmem:[#allocation2 + $0x71] sm:$0xff]  ;;  %v3194_v23 = vpack.i.bf16 %v1963_v21, %v4177_v12  ;;  %v4204_v25 = vld [vmem:[#allocation2 + $0x82] sm:$0xff]  ;;  %v3214_v31 = vpack.i.bf16 %v1995_v62, %v1971_v22  ;;  %2839 = vmatprep.subr.bf16.mxu0 %v2838_v63 }
 0x1f0   : > { %v3179_v57 = vpack.i.bf16 %v1993_v17, %v1969_v0  ;;  %v4197_v20 = vld [vmem:[#allocation2 + $0x72] sm:$0xff]  ;;  %v3199_v26 = vpack.i.bf16 %v1971_v22, %v1993_v17  ;;  %v1584_v3 = vld [vmem:[%s4833_s7 + $0xa0] sm:$0xff]  ;;  %2841 = vmatpush3.bf16.msra.mxu0 %v2840_v43  ;;  %v1573_v63 = vld [vmem:[%s4833_s7 + $0x48] sm:$0xff] }
 0x1f1   : > { %3115 = vrot.lane.b32.xlu0 %v3109_v54, %s4847_s21  ;;  %v3189_v53 = vpack.i.bf16 %v4197_v20, %v4175_v15  ;;  %v3204_v13 = vpack.i.bf16 %v4204_v25, %v4197_v20  ;;  %2843 = vmatprep.subr.bf16.mxu0 %v2842_v44  ;;  %v1571_v17 = vld [vmem:[%s4833_s7 + $0x38] sm:$0xff]  ;;  %v1588_v21 = vld [vmem:[%s4833_s7 + $0xc0] sm:$0xff] }
 0x1f2   : > { %3110 = vrot.lane.b32.xlu1 %v3109_v54, %s4860_s23  ;;  %v1572_v32 = vld [vmem:[%s4833_s7 + $0x40] sm:$0xff] }
 0x1f4   : > { %2845 = vmatpush3.bf16.msra.mxu0 %v2844_v50  ;;  %v2856_v50 = vpack.c.bf16 %v1573_v63, %v1572_v32 }
 0x1f5   : > { %3125 = vrot.lane.b32.xlu0 %v3124_v60, %s3407_s27  ;;  %v1568_v60 = vld [vmem:[%s4833_s7 + $0x20] sm:$0xff] }
 0x1f6   : > { %3120 = vrot.lane.b32.xlu1 %v3119_v55, %s4850_s22  ;;  %v2846_v55 = vpack.c.bf16 %v1585_v48, %v1584_v3  ;;  %v2848_v0 = vpack.c.bf16 %v1569_v61, %v1568_v60  ;;  %v1575_v60 = vld [vmem:[%s4833_s7 + $0x58] sm:$0xff] }
 0x1f8   : > { %2847 = vmatprep.subr.bf16.mxu0 %v2846_v55  ;;  %v1574_v55 = vld [vmem:[%s4833_s7 + $0x50] sm:$0xff] }
 0x1f9   : > { %3135 = vrot.lane.b32.xlu0 %v3134_v2, %s3408_s17  ;;  %v1586_v2 = vld [vmem:[%s4833_s7 + $0xb0] sm:$0xff]  ;;  %2849 = vmatpush3.bf16.msra.mxu0 %v2848_v0 }
 0x1fa   : > { %3130 = vrot.lane.b32.xlu1 %v3129_v1, %s4848_s15 }
 0x1fd   : > { %3145 = vrot.lane.b32.xlu0 %v3144_v4, %s4860_s23 }
 0x1fe   : > { %3140 = vrot.lane.b32.xlu1 %v3139_v5, %s4859_s20 }
 0x201   : > { %3155 = vrot.lane.b32.xlu0 %v3154_v8, %s4850_s22 }
 0x202   : > { %3150 = vrot.lane.b32.xlu1 %v3144_v4, %s4847_s21 }
 0x205   : > { %3165 = vrot.lane.b32.xlu0 %v3164_v14, %s4848_s15 }
 0x206   : > { %3160 = vrot.lane.b32.xlu1 %v3159_v24, %s3407_s27 }
 0x209   : > { %3175 = vrot.lane.b32.xlu0 %v3174_v16, %s4859_s20  ;;  %v1570_v16 = vld [vmem:[%s4833_s7 + $0x30] sm:$0xff] }
 0x20a   : > { %3170 = vrot.lane.b32.xlu1 %v3169_v51, %s3408_s17  ;;  %v2850_v51 = vpack.c.bf16 %v1587_v28, %v1586_v2 }
 0x20c   : > { %2851 = vmatprep.subr.bf16.mxu0 %v2850_v51 }
 0x20d   : > { %3185 = vrot.lane.b32.xlu0 %v3179_v57, %s4847_s21  ;;  %s4862_s21 = smov 64  }
 0x20e   : > { %3180 = vrot.lane.b32.xlu1 %v3179_v57, %s4860_s23 }
 0x211   : > { %3195 = vrot.lane.b32.xlu0 %v3194_v23, %s3407_s27  ;;  %s4861_s27 = smov 32  }
 0x212   : > { %3190 = vrot.lane.b32.xlu1 %v3189_v53, %s4850_s22  ;;  %v1589_v53 = vld [vmem:[%s4833_s7 + $0xc8] sm:$0xff] }
 0x213   : > { %v2854_v11 = vpack.c.bf16 %v1589_v53, %v1588_v21 }
 0x215   : > { %3205 = vrot.lane.b32.xlu0 %v3204_v13, %s3408_s17 }
 0x216   : > { %3200 = vrot.lane.b32.xlu1 %v3199_v26, %s4848_s15 }
 0x219   : > { %3215 = vrot.lane.b32.xlu0 %v3214_v31, %s4860_s23  ;;  %s2686_s23 = sshll.u32 %s3505_s29, 11  ;;  %s4784_s29 = scalar_lea.sflag [#allocation5], %s431_s14 }
 0x21a   : > { %3210 = vrot.lane.b32.xlu1 %v3209_v40, %s4859_s20  ;;  %v2852_v40 = vpack.c.bf16 %v1571_v17, %v1570_v16  ;;  %s4770_s16 = scalar_lea.hbm %s4839_s13, %s2686_s23 }
 0x21c   : > { %2853 = vmatpush3.bf16.msra.mxu0 %v2852_v40 }
 0x21d   : > { %2855 = vmatprep.subr.bf16.mxu0 %v2854_v11 }
 0x220   : > { %2857 = vmatpush3.bf16.msra.mxu0 %v2856_v50 }
 0x257   : > { %v3086_v34 = vpop.permute.xlu0 %3085 }
 0x258   : > { %v3081_v54 = vpop.permute.xlu1 %3080  ;;  %v3087_v4 = vunpack.i.l.bf16 %v3086_v34  ;;  %v3088_v23 = vunpack.i.h.bf16 %v3086_v34 }
 0x259   : > { %v3082_v1 = vunpack.i.l.bf16 %v3081_v54  ;;  %v3083_v5 = vunpack.i.h.bf16 %v3081_v54 }
 0x25b   : > { %v2228_v8 = vsel %vm647_vm1, %v1932_v52, %v3082_v1  ;;  %v3096_v14 = vpop.permute.xlu0 %3095  ;;  %v2229_v13 = vsel %vm647_vm1, %v4117_v38, %v3083_v5  ;;  %v1590_v38 = vld [vmem:[%s4833_s7 + $0xd0] sm:$0xff] }
 0x25c   : > { %v3091_v24 = vpop.permute.xlu1 %3090  ;;  %v3097_v22 = vunpack.i.l.bf16 %v3096_v14  ;;  %v2236_v26 = vsel %vm983_vm3, %v2228_v8, %v3087_v4  ;;  %v3098_v42 = vunpack.i.h.bf16 %v3096_v14  ;;  %v2237_v43 = vsel %vm983_vm3, %v2229_v13, %v3088_v23 }
 0x25d   : > { %v3092_v57 = vunpack.i.l.bf16 %v3091_v24  ;;  %v3093_v29 = vunpack.i.h.bf16 %v3091_v24  ;;  %v2858_v54 = vpack.c.bf16 %v1591_v37, %v1590_v38  ;;  %v2860_v14 = vpack.c.bf16 %v1575_v60, %v1574_v55 }
 0x25f   : > { %v2244_v62 = vsel %vm992_vm4, %v2236_v26, %v3092_v57  ;;  %v3106_v31 = vpop.permute.xlu0 %3105  ;;  %v2245_v46 = vsel %vm992_vm4, %v2237_v43, %v3093_v29  ;;  %2859 = vmatprep.subr.bf16.mxu0 %v2858_v54 }
 0x260   : > { %v3101_v30 = vpop.permute.xlu1 %3100  ;;  %v3107_v44 = vunpack.i.l.bf16 %v3106_v31  ;;  %v2252_v45 = vsel %vm479_vm0, %v2244_v62, %v3097_v22  ;;  %v3108_v1 = vunpack.i.h.bf16 %v3106_v31  ;;  %v2253_v4 = vsel %vm479_vm0, %v2245_v46, %v3098_v42  ;;  %2861 = vmatpush3.bf16.msra.mxu0 %v2860_v14 }
 0x261   : > { %v3102_v36 = vunpack.i.l.bf16 %v3101_v30  ;;  %v3103_v3 = vunpack.i.h.bf16 %v3101_v30 }
 0x263   : > { %v2260_v48 = vsel %vm1009_vm5, %v2252_v45, %v3102_v36  ;;  %v3116_v34 = vpop.permute.xlu0 %3115  ;;  %v2261_v0 = vsel %vm1009_vm5, %v2253_v4, %v3103_v3 }
 0x264   : > { %v3111_v52 = vpop.permute.xlu1 %3110  ;;  %v3117_v2 = vunpack.i.l.bf16 %v3116_v34  ;;  %v2268_v28 = vsel %vm1018_vm6, %v2260_v48, %v3107_v44  ;;  %v3118_v24 = vunpack.i.h.bf16 %v3116_v34  ;;  %v2269_v23 = vsel %vm1018_vm6, %v2261_v0, %v3108_v1 }
 0x265   : > { %v3112_v61 = vunpack.i.l.bf16 %v3111_v52  ;;  %v3113_v5 = vunpack.i.h.bf16 %v3111_v52 }
 0x266   : > { %v2230_v21 = vsel %vm647_vm1, %v4119_v39, %v3117_v2  ;;  %v2231_v13 = vsel %vm647_vm1, %v4134_v49, %v3118_v24 }
 0x267   : > { %v2276_v8 = vsel %vm1027_vm7, %v2268_v28, %v3112_v61  ;;  %v3126_v51 = vpop.permute.xlu0 %3125  ;;  %v2277_v26 = vsel %vm1027_vm7, %v2269_v23, %v3113_v5 }
 0x268   : > { %v3121_v16 = vpop.permute.xlu1 %3120  ;;  %2391 = vmatmul.mubr.f32.vlgmr.msra.gmra.mrb[16].mxu1 %v2276_v8  ;;  %v3127_v53 = vunpack.i.l.bf16 %v3126_v51  ;;  %v3128_v29 = vunpack.i.h.bf16 %v3126_v51 }
 0x269   : > { %v3123_v17 = vunpack.i.h.bf16 %v3121_v16  ;;  %v3122_v57 = vunpack.i.l.bf16 %v3121_v16  ;;  %2671 = vmatprep.mubr.msk.f32.mxu1 %vm647_vm1, %v4142_v56 }
 0x26b   : > { %v2238_v22 = vsel %vm983_vm3, %v2230_v21, %v3122_v57  ;;  %v3136_v62 = vpop.permute.xlu0 %3135  ;;  %v2239_v56 = vsel %vm983_vm3, %v2231_v13, %v3123_v17  ;;  %v4334_v17 = vld [vmem:[%s4831_s5] ss:$0 sm:$0xff] }
 0x26c   : > { %v3131_v40 = vpop.permute.xlu1 %3130  ;;  %2396 = vmatmul.mubr.f32.gmra.mrb[18].mxu1 %v2277_v26  ;;  %v3137_v39 = vunpack.i.l.bf16 %v3136_v62  ;;  %v2246_v11 = vsel %vm992_vm4, %v2238_v22, %v3127_v53  ;;  %v3138_v63 = vunpack.i.h.bf16 %v3136_v62  ;;  %v2247_v36 = vsel %vm992_vm4, %v2239_v56, %v3128_v29  ;;  %v4341_v22 = vld [vmem:[%s4832_s6] ss:$0 sm:$0xff] }
 0x26d   : > { %v3133_v31 = vunpack.i.h.bf16 %v3131_v40  ;;  %v3132_v30 = vunpack.i.l.bf16 %v3131_v40  ;;  %2672 = vmatprep.mubr.msk.f32.mxu1 %vm647_vm1, %v4151_v41 }
 0x26f   : > { %v2254_v32 = vsel %vm479_vm0, %v2246_v11, %v3132_v30  ;;  %v3146_v49 = vpop.permute.xlu0 %3145  ;;  %v2255_v37 = vsel %vm479_vm0, %v2247_v36, %v3133_v31 }
 0x270   : > { %v3141_v38 = vpop.permute.xlu1 %3140  ;;  %v3147_v42 = vunpack.i.l.bf16 %v3146_v49  ;;  %v2262_v45 = vsel %vm1009_vm5, %v2254_v32, %v3137_v39  ;;  %v3148_v41 = vunpack.i.h.bf16 %v3146_v49  ;;  %v2263_v34 = vsel %vm1009_vm5, %v2255_v37, %v3138_v63  ;;  %v1593_v37 = vld [vmem:[%s4833_s7 + $0xe8] sm:$0xff] }
 0x271   : > { %v3143_v43 = vunpack.i.h.bf16 %v3141_v38  ;;  %v3142_v44 = vunpack.i.l.bf16 %v3141_v38  ;;  %v1592_v38 = vld [vmem:[%s4833_s7 + $0xe0] sm:$0xff] }
 0x273   : > { %v2270_v46 = vsel %vm1018_vm6, %v2262_v45, %v3142_v44  ;;  %v3156_v3 = vpop.permute.xlu0 %3155  ;;  %v2271_v54 = vsel %vm1018_vm6, %v2263_v34, %v3143_v43 }
 0x274   : > { %v3151_v48 = vpop.permute.xlu1 %3150  ;;  %v2278_v50 = vsel %vm1027_vm7, %v2270_v46, %v3147_v42  ;;  %v3157_v55 = vunpack.i.l.bf16 %v3156_v3  ;;  %v2279_v28 = vsel %vm1027_vm7, %v2271_v54, %v3148_v41  ;;  %v3158_v5 = vunpack.i.h.bf16 %v3156_v3  ;;  %v1576_v3 = vld [vmem:[%s4833_s7 + $0x60] sm:$0xff] }
 0x275   : > { %v3152_v52 = vunpack.i.l.bf16 %v3151_v48  ;;  %2401 = vmatmul.mubr.f32.gmra.mrb[20].mxu1 %v2278_v50  ;;  %v3153_v60 = vunpack.i.h.bf16 %v3151_v48  ;;  %v1577_v48 = vld [vmem:[%s4833_s7 + $0x68] sm:$0xff] }
 0x276   : > { %2673 = vmatprep.mubr.msk.f32.mxu1 %vm647_vm1, %v4163_v7  ;;  %v2864_v54 = vpack.c.bf16 %v1577_v48, %v1576_v3 }
 0x277   : > { %v2232_v61 = vsel %vm647_vm1, %v4144_v58, %v3152_v52  ;;  %v3166_v1 = vpop.permute.xlu0 %3165  ;;  %v2233_v8 = vsel %vm647_vm1, %v4157_v33, %v3153_v60  ;;  %v2862_v52 = vpack.c.bf16 %v1593_v37, %v1592_v38  ;;  %v1267_v38 = vld [vmem:[#allocation3 + $0x2] sm:$0xff] }
 0x278   : > { %v3161_v2 = vpop.permute.xlu1 %3160  ;;  %v3167_v0 = vunpack.i.l.bf16 %v3166_v1  ;;  %v2240_v14 = vsel %vm983_vm3, %v2232_v61, %v3157_v55  ;;  %v3168_v57 = vunpack.i.h.bf16 %v3166_v1 }
 0x279   : > { %v3162_v4 = vunpack.i.l.bf16 %v3161_v2  ;;  %2406 = vmatmul.mubr.f32.gmra.mrb[22].mxu1 %v2279_v28  ;;  %v3163_v7 = vunpack.i.h.bf16 %v3161_v2  ;;  %2863 = vmatprep.subr.bf16.mxu0 %v2862_v52 }
 0x27a   : > { %2674 = vmatprep.mubr.msk.f32.mxu1 %vm647_vm1, %v4175_v15  ;;  %v2241_v15 = vsel %vm983_vm3, %v2233_v8, %v3158_v5  ;;  %v1595_v5 = vld [vmem:[%s4833_s7 + $0xf8] sm:$0xff]  ;;  %2865 = vmatpush3.bf16.msra.mxu0 %v2864_v54 }
 0x27b   : > { %v2248_v24 = vsel %vm992_vm4, %v2240_v14, %v3162_v4  ;;  %v3176_v58 = vpop.permute.xlu0 %3175  ;;  %v2249_v21 = vsel %vm992_vm4, %v2241_v15, %v3163_v7  ;;  %v1594_v4 = vld [vmem:[%s4833_s7 + $0xf0] sm:$0xff] }
 0x27c   : > { %v3171_v51 = vpop.permute.xlu1 %3170  ;;  %v3177_v33 = vunpack.i.l.bf16 %v3176_v58  ;;  %v2256_v26 = vsel %vm479_vm0, %v2248_v24, %v3167_v0  ;;  %v2257_v39 = vsel %vm479_vm0, %v2249_v21, %v3168_v57  ;;  %v3178_v11 = vunpack.i.h.bf16 %v3176_v58  ;;  %v1578_v14 = vld [vmem:[%s4833_s7 + $0x70] sm:$0xff]  ;;  %v1579_v24 = vld [vmem:[%s4833_s7 + $0x78] sm:$0xff] }
 0x27d   : > { %v3172_v16 = vunpack.i.l.bf16 %v3171_v51  ;;  %v3173_v53 = vunpack.i.h.bf16 %v3171_v51 }
 0x27e   : > { %v1144_v23 = vpop.f32.mrb[0].mxu1 }
 0x27f   : > { %v1190_v13 = vmul.f32 %v4334_v17, %v1144_v23  ;;  %v1146_v29 = vpop.f32.mrb[1].mxu1  ;;  %v3186_v62 = vpop.permute.xlu0 %3185  ;;  %v2264_v40 = vsel %vm1009_vm5, %v2256_v26, %v3172_v16  ;;  %v2265_v49 = vsel %vm1009_vm5, %v2257_v39, %v3173_v53  ;;  %v1259_v26 = vld [vmem:[#allocation3 + $0x1] sm:$0xff] }
 0x280   : > { %v3181_v56 = vpop.permute.xlu1 %3180  ;;  %v3187_v32 = vunpack.i.l.bf16 %v3186_v62  ;;  %v2272_v36 = vsel %vm1018_vm6, %v2264_v40, %v3177_v33  ;;  %v3188_v50 = vunpack.i.h.bf16 %v3186_v62  ;;  %v2273_v28 = vsel %vm1018_vm6, %v2265_v49, %v3178_v11 }
 0x281   : > { %v1205_v31 = vadd.f32 %v4341_v22, %v1190_v13  ;;  %v3182_v30 = vunpack.i.l.bf16 %v3181_v56  ;;  %v3183_v43 = vunpack.i.h.bf16 %v3181_v56  ;;  %v2868_v33 = vpack.c.bf16 %v1579_v24, %v1578_v14 }
 0x282   : > { %v1149_v63 = vpop.f32.mrb[2].mxu1  ;;  %v2234_v1 = vsel %vm647_vm1, %v4169_v10, %v3187_v32  ;;  %v2866_v10 = vpack.c.bf16 %v1595_v5, %v1594_v4  ;;  %v2235_v58 = vsel %vm647_vm1, %v4177_v12, %v3188_v50 }
 0x283   : > { %v1213_v42 = vmax.f32 %v1205_v31, 0.0  ;;  %v1191_v44 = vmul.f32 %v4334_v17, %v1149_v63  ;;  %v1151_v45 = vpop.f32.mrb[3].mxu1  ;;  %v2280_v46 = vsel %vm1027_vm7, %v2272_v36, %v3182_v30  ;;  %v3196_v41 = vpop.permute.xlu0 %3195 }
 0x284   : > { %v3191_v34 = vpop.permute.xlu1 %3190  ;;  %2411 = vmatmul.mubr.f32.gmra.mrb[24].mxu1 %v2280_v46  ;;  %v3197_v2 = vunpack.i.l.bf16 %v3196_v41  ;;  %v3198_v51 = vunpack.i.h.bf16 %v3196_v41  ;;  %2867 = vmatprep.subr.bf16.mxu0 %v2866_v10 }
 0x285   : > { %1243 = vst.msk [vmem:[#allocation3 + $0x11] sm:$0xff] %vm983_vm3, %v1213_v42  ;;  %v1206_v55 = vadd.f32 %v4341_v22, %v1191_v44  ;;  %v3193_v60 = vunpack.i.h.bf16 %v3191_v34  ;;  %v3192_v61 = vunpack.i.l.bf16 %v3191_v34  ;;  %2675 = vmatprep.mubr.msk.f32.mxu1 %vm647_vm1, %v4197_v20  ;;  %v2281_v20 = vsel %vm1027_vm7, %v2273_v28, %v3183_v43  ;;  %2869 = vmatpush3.bf16.msra.mxu0 %v2868_v33  ;;  %v2003_v42 = vld [vmem:[#allocation2 + $0x92] sm:$0xff] }
 0x287   : > { %v1214_v8 = vmax.f32 %v1206_v55, 0.0  ;;  %v2242_v0 = vsel %vm983_vm3, %v2234_v1, %v3192_v61  ;;  %v3206_v7 = vpop.permute.xlu0 %3205  ;;  %v2243_v57 = vsel %vm983_vm3, %v2235_v58, %v3193_v60 }
 0x288   : > { %2416 = vmatmul.mubr.f32.gmra.mrb[26].mxu1 %v2281_v20  ;;  %v3201_v16 = vpop.permute.xlu1 %3200  ;;  %v2250_v53 = vsel %vm992_vm4, %v2242_v0, %v3197_v2  ;;  %v3207_v23 = vunpack.i.l.bf16 %v3206_v7  ;;  %v2251_v29 = vsel %vm992_vm4, %v2243_v57, %v3198_v51  ;;  %v3208_v62 = vunpack.i.h.bf16 %v3206_v7 }
 0x289   : > { %1244 = vst.msk [vmem:[#allocation3 + $0x21] sm:$0xff] %vm983_vm3, %v1214_v8  ;;  %v3203_v15 = vunpack.i.h.bf16 %v3201_v16  ;;  %v3202_v21 = vunpack.i.l.bf16 %v3201_v16  ;;  %2676 = vmatprep.mubr.msk.f32.mxu1 %vm647_vm1, %v4204_v25 }
 0x28b   : > { %v2258_v12 = vsel %vm479_vm0, %v2250_v53, %v3202_v21  ;;  %v3216_v13 = vpop.permute.xlu0 %3215  ;;  %v2259_v30 = vsel %vm479_vm0, %v2251_v29, %v3203_v15  ;;  %v1596_v15 = vld [vmem:[%s4833_s7 + $0x100] sm:$0xff]  ;;  %v1597_v21 = vld [vmem:[%s4833_s7 + $0x108] sm:$0xff] }
 0x28c   : > { %v3211_v40 = vpop.permute.xlu1 %3210  ;;  %v3217_v56 = vunpack.i.l.bf16 %v3216_v13  ;;  %v1291_v31 = vld [vmem:[#allocation3 + $0x12] sm:$0xff]  ;;  %v2266_v49 = vsel %vm1009_vm5, %v2258_v12, %v3207_v23  ;;  %v3218_v43 = vunpack.i.h.bf16 %v3216_v13  ;;  %v2267_v48 = vsel %vm1009_vm5, %v2259_v30, %v3208_v62 }
 0x28d   : > { %v3213_v39 = vunpack.i.h.bf16 %v3211_v40  ;;  %v3212_v25 = vunpack.i.l.bf16 %v3211_v40  ;;  %v1154_v11 = vpop.f32.mrb[4].mxu1  ;;  %v3219_v32 = vpack.i.bf16 %v1259_v26, %v1291_v31  ;;  %v4401_v46 = vld [vmem:[#allocation3 + $0x10] sm:$0xff]  ;;  %v4449_v12 = vpack.c.bf16 %v1597_v21, %v1596_v15 }
 0x28e   : > { %v1192_v63 = vmul.f32 %v4334_v17, %v1154_v11  ;;  %v1156_v36 = vpop.f32.mrb[5].mxu1  ;;  %v4421_v4 = vld [vmem:[#allocation3 + $0x11] sm:$0xff] }
 0x28f   : > { %3220 = vrot.lane.b32.xlu1 %v3219_v32, %s4861_s27  ;;  %v2274_v37 = vsel %vm1018_vm6, %v2266_v49, %v3212_v25  ;;  %v2275_v54 = vsel %vm1018_vm6, %v2267_v48, %v3213_v39  ;;  %2871 = vmatprep.subr.bf16.mxu0 %v4449_v12  ;;  %v1307_v21 = vld [vmem:[#allocation3 + $0x90] sm:$0xff] }
 0x290   : > { %v1207_v44 = vadd.f32 %v4341_v22, %v1192_v63  ;;  %v2282_v45 = vsel %vm1027_vm7, %v2274_v37, %v3217_v56  ;;  %v4403_v41 = vld [vmem:[#allocation3 + $0x21] sm:$0xff]  ;;  %v2283_v28 = vsel %vm1027_vm7, %v2275_v54, %v3218_v43 }
 0x291   : > { %v4405_v3 = vld [vmem:[#allocation3 + $0x20] sm:$0xff]  ;;  %2421 = vmatmul.mubr.f32.gmra.mrb[28].mxu1 %v2282_v45  ;;  %v1159_v50 = vpop.f32.mrb[6].mxu1  ;;  %v3229_v34 = vpack.i.bf16 %v4401_v46, %v4403_v41 }
 0x292   : > { %v3224_v52 = vpack.i.bf16 %v1267_v38, %v4405_v3  ;;  %v1215_v55 = vmax.f32 %v1207_v44, 0.0  ;;  %v1193_v60 = vmul.f32 %v4334_v17, %v1159_v50  ;;  %v1161_v61 = vpop.f32.mrb[7].mxu1  ;;  %2677 = vmatprep.mubr.msk.f32.mxu1 %vm647_vm1, %v2003_v42  ;;  %v4414_v1 = vld [vmem:[#allocation3 + $0x22] sm:$0xff] }
 0x293   : > { %3230 = vrot.lane.b32.xlu1 %v3229_v34, %s4859_s20  ;;  %v3234_v5 = vpack.i.bf16 %v4421_v4, %v4414_v1 }
 0x294   : > { %3225 = vrot.lane.b32.xlu0 %v3224_v52, %s4862_s21  ;;  %1245 = vst.msk [vmem:[#allocation3 + $0x31] sm:$0xff] %vm983_vm3, %v1215_v55  ;;  %v1208_v2 = vadd.f32 %v4341_v22, %v1193_v60 }
 0x295   : > { %2426 = vmatmul.mubr.f32.gmra.mrb[30].mxu1 %v2283_v28 }
 0x296   : > { %v1216_v8 = vmax.f32 %v1208_v2, 0.0 }
 0x298   : > { %3235 = vrot.lane.b32.xlu0 %v3234_v5, %s4861_s27  ;;  %1246 = vst.msk [vmem:[#allocation3 + $0x41] sm:$0xff] %vm983_vm3, %v1216_v8 }
 0x29a   : > { %v1164_v0 = vpop.f32.mrb[8].mxu1 }
 0x29b   : > { %v1194_v20 = vmul.f32 %v4334_v17, %v1164_v0  ;;  %v1166_v7 = vpop.f32.mrb[9].mxu1  ;;  %v4428_v10 = vld [vmem:[#allocation3 + $0x30] sm:$0xff] }
 0x29c   : > { %v4430_v14 = vld [vmem:[#allocation3 + $0x31] sm:$0xff]  ;;  %v3239_v24 = vpack.i.bf16 %v1291_v31, %v4428_v10 }
 0x29d   : > { %v3244_v58 = vpack.i.bf16 %v4405_v3, %v4430_v14  ;;  %v1209_v51 = vadd.f32 %v4341_v22, %v1194_v20  ;;  %v4436_v16 = vld [vmem:[#allocation3 + $0x32] sm:$0xff] }
 0x29e   : > { %v1169_v57 = vpop.f32.mrb[10].mxu1  ;;  %3240 = vrot.lane.b32.xlu1 %v3239_v24, %s4862_s21  ;;  %v3249_v13 = vpack.i.bf16 %v4403_v41, %v4436_v16 }
 0x29f   : > { %3245 = vrot.lane.b32.xlu0 %v3244_v58, %s4859_s20  ;;  %v1217_v33 = vmax.f32 %v1209_v51, 0.0  ;;  %v1195_v53 = vmul.f32 %v4334_v17, %v1169_v57  ;;  %v1171_v23 = vpop.f32.mrb[11].mxu1  ;;  %v4447_v26 = vld [vmem:[#allocation3 + $0x40] sm:$0xff] }
 0x2a0   : > { %v3254_v29 = vpack.i.bf16 %v4414_v1, %v4447_v26  ;;  %v4457_v40 = vld [vmem:[#allocation3 + $0x41] sm:$0xff] }
 0x2a1   : > { %1247 = vst.msk [vmem:[#allocation3 + $0x51] sm:$0xff] %vm983_vm3, %v1217_v33  ;;  %v1210_v62 = vadd.f32 %v4341_v22, %v1195_v53  ;;  %v4459_v56 = vld [vmem:[#allocation3 + $0x42] sm:$0xff]  ;;  %v3259_v30 = vpack.i.bf16 %v4428_v10, %v4457_v40  ;;  %v1315_v33 = vld [vmem:[#allocation3 + $0x91] sm:$0xff] }
 0x2a2   : > { %3250 = vrot.lane.b32.xlu1 %v3249_v13, %s4861_s27  ;;  %v3264_v39 = vpack.i.bf16 %v4430_v14, %v4459_v56 }
 0x2a3   : > { %3255 = vrot.lane.b32.xlu0 %v3254_v29, %s4862_s21  ;;  %v1218_v31 = vmax.f32 %v1210_v62, 0.0 }
 0x2a5   : > { %1248 = vst.msk [vmem:[#allocation3 + $0x61] sm:$0xff] %vm983_vm3, %v1218_v31  ;;  %v1251_v31 = vld [vmem:[#allocation3] sm:$0xff] }
 0x2a6   : > { %3260 = vrot.lane.b32.xlu1 %v3259_v30, %s4859_s20 }
 0x2a7   : > { %3265 = vrot.lane.b32.xlu0 %v3264_v39, %s4861_s27 }
 0x2a8   : > { %v4471_v25 = vld [vmem:[#allocation3 + $0x50] sm:$0xff] }
 0x2a9   : > { %v4473_v11 = vld [vmem:[#allocation3 + $0x51] sm:$0xff]  ;;  %v1174_v32 = vpop.f32.mrb[12].mxu1  ;;  %v3269_v63 = vpack.i.bf16 %v4436_v16, %v4471_v25 }
 0x2aa   : > { %v3274_v36 = vpack.i.bf16 %v4447_v26, %v4473_v11  ;;  %v1196_v49 = vmul.f32 %v4334_v17, %v1174_v32  ;;  %v1176_v38 = vpop.f32.mrb[13].mxu1  ;;  %v4480_v37 = vld [vmem:[#allocation3 + $0x52] sm:$0xff] }
 0x2ab   : > { %3270 = vrot.lane.b32.xlu1 %v3269_v63, %s4862_s21  ;;  %v3279_v45 = vpack.i.bf16 %v4457_v40, %v4480_v37 }
 0x2ac   : > { %3275 = vrot.lane.b32.xlu0 %v3274_v36, %s4859_s20  ;;  %v1211_v42 = vadd.f32 %v4341_v22, %v1196_v49  ;;  %v4485_v43 = vld [vmem:[#allocation3 + $0x60] sm:$0xff] }
 0x2ad   : > { %v1179_v44 = vpop.f32.mrb[14].mxu1  ;;  %v3284_v48 = vpack.i.bf16 %v4459_v56, %v4485_v43  ;;  %v4492_v54 = vld [vmem:[#allocation3 + $0x61] sm:$0xff] }
 0x2ae   : > { %v1219_v50 = vmax.f32 %v1211_v42, 0.0  ;;  %v1197_v34 = vmul.f32 %v4334_v17, %v1179_v44  ;;  %v1181_v52 = vpop.f32.mrb[15].mxu1  ;;  %v4494_v55 = vld [vmem:[#allocation3 + $0x62] sm:$0xff]  ;;  %v3289_v61 = vpack.i.bf16 %v4471_v25, %v4492_v54 }
 0x2af   : > { %3280 = vrot.lane.b32.xlu1 %v3279_v45, %s4861_s27  ;;  %v3294_v2 = vpack.i.bf16 %v4473_v11, %v4494_v55 }
 0x2b0   : > { %3285 = vrot.lane.b32.xlu0 %v3284_v48, %s4862_s21  ;;  %1249 = vst.msk [vmem:[#allocation3 + $0x71] sm:$0xff] %vm983_vm3, %v1219_v50  ;;  %v1212_v60 = vadd.f32 %v4341_v22, %v1197_v34 }
 0x2b2   : > { %v1220_v17 = vmax.f32 %v1212_v60, 0.0 }
 0x2b3   : > { %3290 = vrot.lane.b32.xlu1 %v3289_v61, %s4859_s20 }
 0x2b4   : > { %3295 = vrot.lane.b32.xlu0 %v3294_v2, %s4861_s27  ;;  %1250 = vst.msk [vmem:[#allocation3 + $0x81] sm:$0xff] %vm983_vm3, %v1220_v17 }
 0x2b7   : > { %v4507_v28 = vld [vmem:[#allocation3 + $0x70] sm:$0xff] }
 0x2b8   : > { %v4509_v5 = vld [vmem:[#allocation3 + $0x71] sm:$0xff]  ;;  %v3299_v22 = vpack.i.bf16 %v4480_v37, %v4507_v28 }
 0x2b9   : > { %v3304_v8 = vpack.i.bf16 %v4485_v43, %v4509_v5  ;;  %v4515_v0 = vld [vmem:[#allocation3 + $0x72] sm:$0xff] }
 0x2ba   : > { %3300 = vrot.lane.b32.xlu1 %v3299_v22, %s4862_s21  ;;  %v3309_v7 = vpack.i.bf16 %v4492_v54, %v4515_v0  ;;  %v3324_v53 = vpack.i.bf16 %v4515_v0, %v1307_v21 }
 0x2bb   : > { %3305 = vrot.lane.b32.xlu0 %v3304_v8, %s4859_s20  ;;  %v1306_v20 = vld [vmem:[#allocation3 + $0x80] sm:$0xff] }
 0x2bc   : > { %v3314_v24 = vpack.i.bf16 %v4494_v55, %v1306_v20  ;;  %v4522_v58 = vld [vmem:[#allocation3 + $0x81] sm:$0xff]  ;;  %v3334_v23 = vpack.i.bf16 %v1306_v20, %v1315_v33 }
 0x2bd   : > { %v4524_v51 = vld [vmem:[#allocation3 + $0x82] sm:$0xff]  ;;  %v3319_v57 = vpack.i.bf16 %v4507_v28, %v4522_v58 }
 0x2be   : > { %3310 = vrot.lane.b32.xlu1 %v3309_v7, %s4861_s27  ;;  %v3329_v15 = vpack.i.bf16 %v4509_v5, %v4524_v51 }
 0x2bf   : > { %3315 = vrot.lane.b32.xlu0 %v3314_v24, %s4862_s21 }
 0x2c2   : > { %3320 = vrot.lane.b32.xlu1 %v3319_v57, %s4859_s20 }
 0x2c3   : > { %3330 = vrot.lane.b32.xlu0 %v3329_v15, %s4861_s27 }
 0x2c6   : > { %3325 = vrot.lane.b32.xlu1 %v3324_v53, %s4862_s21 }
 0x2c7   : > { %3335 = vrot.lane.b32.xlu0 %v3334_v23, %s4859_s20  ;;  %s4638_s20 = scalar_lea.vmem [#allocation4], %s2637_s24 }
 0x2c8   : > { %s2571_s24 = sshll.u32 %s4638_s20, 4  ;;  %s4776_s24 = int_to_ptr.vmem [resolvable:$true] %s2571_s24 }
 0x2c9   : > { %s3339_s0 = scalar_lea.vmem %s4776_s24, 2048 }
 0x2ca   : > { %2501 = vrot.lane.b32.xlu1 %v3751_v19, %s4862_s21  ;;  %p3340_p11 = scmp.ne.s32.totalorder %s4776_s24, %s3339_s0 }
 0x2cb   : > { %2503 = vrot.lane.b32.xlu0 %v3784_v27, %s4862_s21 }
 0x2cc   : > { %p3341_p12 = pnand %p3340_p11, %p3522_p5 }
 0x2ce   : > { %2505 = vrot.lane.b32.xlu1 %v3797_v35, %s4862_s21  ;;  %v1598_v35 = vld [vmem:[%s4833_s7 + $0x110] sm:$0xff]  ;;  %p3342_p13 = pneg %p3341_p12 }
 0x2cf   : > { %2507 = vrot.lane.b32.xlu0 %v3817_v47, %s4862_s21  ;;  %v1599_v47 = vld [vmem:[%s4833_s7 + $0x118] sm:$0xff] }
 0x2d0   : > { %v2874_v44 = vpack.c.bf16 %v1599_v47, %v1598_v35 }
 0x2d2   : > { %2509 = vrot.lane.b32.xlu1 %v3835_v59, %s4862_s21 }
 0x2d3   : > { %2511 = vrot.lane.b32.xlu0 %v3853_v6, %s4862_s21 }
 0x301   : > { %v3221_v13 = vpop.permute.xlu1 %3220 }
 0x302   : > { %v3223_v29 = vunpack.i.h.bf16 %v3221_v13  ;;  %v3222_v62 = vunpack.i.l.bf16 %v3221_v13 }
 0x304   : > { %v1516_v59 = vsel %vm983_vm3, %v1251_v31, %v3223_v29  ;;  %v1540_v6 = vsel %vm983_vm3, %v4421_v4, %v3222_v62 }
 0x305   : > { %v3231_v19 = vpop.permute.xlu1 %3230 }
 0x306   : > { %v3226_v30 = vpop.permute.xlu0 %3225  ;;  %v3233_v39 = vunpack.i.h.bf16 %v3231_v19  ;;  %v3232_v27 = vunpack.i.l.bf16 %v3231_v19 }
 0x307   : > { %v3228_v32 = vunpack.i.h.bf16 %v3226_v30  ;;  %v3227_v63 = vunpack.i.l.bf16 %v3226_v30 }
 0x309   : > { %v1524_v36 = vsel %vm479_vm0, %v1516_v59, %v3228_v32  ;;  %v1548_v49 = vsel %vm479_vm0, %v1540_v6, %v3227_v63 }
 0x30a   : > { %v1556_v38 = vsel %vm1018_vm6, %v1548_v49, %v3232_v27  ;;  %v1532_v42 = vsel %vm1018_vm6, %v1524_v36, %v3233_v39  ;;  %v3236_v45 = vpop.permute.xlu0 %3235 }
 0x30b   : > { %1688 = vmatprep.mubr.f32.mxu0 %v1556_v38  ;;  %v3238_v48 = vunpack.i.h.bf16 %v3236_v45  ;;  %v3237_v50 = vunpack.i.l.bf16 %v3236_v45 }
 0x30c   : > { %1689 = vmatmul.mubr.f32.vlgmr.msra.gmra.mrb[16].mxu0 %v1532_v42 }
 0x30d   : > { %2873 = vmatpush3.bf16.msra.mxu0 %v4449_v12  ;;  %v1541_v17 = vsel %vm983_vm3, %v4403_v41, %v3237_v50  ;;  %v1517_v22 = vsel %vm983_vm3, %v4401_v46, %v3238_v48 }
 0x30e   : > { %2875 = vmatprep.subr.bf16.mxu0 %v2874_v44 }
 0x310   : > { %v3241_v34 = vpop.permute.xlu1 %3240 }
 0x311   : > { %v3246_v52 = vpop.permute.xlu0 %3245  ;;  %2877 = vmatpush3.bf16.msra.mxu0 %v2874_v44  ;;  %v3243_v4 = vunpack.i.h.bf16 %v3241_v34  ;;  %v3242_v60 = vunpack.i.l.bf16 %v3241_v34 }
 0x312   : > { %v3248_v61 = vunpack.i.h.bf16 %v3246_v52  ;;  %v3247_v2 = vunpack.i.l.bf16 %v3246_v52 }
 0x313   : > { %v1549_v8 = vsel %vm479_vm0, %v1541_v17, %v3242_v60  ;;  %v1525_v12 = vsel %vm479_vm0, %v1517_v22, %v3243_v4 }
 0x314   : > { %v3251_v20 = vpop.permute.xlu1 %3250  ;;  %v1557_v24 = vsel %vm1018_vm6, %v1549_v8, %v3247_v2  ;;  %v1533_v57 = vsel %vm1018_vm6, %v1525_v12, %v3248_v61 }
 0x315   : > { %v3256_v7 = vpop.permute.xlu0 %3255  ;;  %v3253_v15 = vunpack.i.h.bf16 %v3251_v20  ;;  %v3252_v21 = vunpack.i.l.bf16 %v3251_v20  ;;  %1693 = vmatprep.mubr.f32.mxu0 %v1557_v24 }
 0x316   : > { %v3258_v33 = vunpack.i.h.bf16 %v3256_v7  ;;  %v3257_v53 = vunpack.i.l.bf16 %v3256_v7  ;;  %1694 = vmatmul.mubr.f32.gmra.mrb[18].mxu0 %v1533_v57 }
 0x317   : > { %v1542_v41 = vsel %vm983_vm3, %v4430_v14, %v3252_v21  ;;  %v1518_v46 = vsel %vm983_vm3, %v4405_v3, %v3253_v15 }
 0x318   : > { %v3261_v23 = vpop.permute.xlu1 %3260  ;;  %v1550_v31 = vsel %vm479_vm0, %v1542_v41, %v3257_v53  ;;  %v1526_v19 = vsel %vm479_vm0, %v1518_v46, %v3258_v33 }
 0x319   : > { %v3266_v13 = vpop.permute.xlu0 %3265  ;;  %v3263_v29 = vunpack.i.h.bf16 %v3261_v23  ;;  %v3262_v62 = vunpack.i.l.bf16 %v3261_v23 }
 0x31a   : > { %v3268_v30 = vunpack.i.h.bf16 %v3266_v13  ;;  %v3267_v39 = vunpack.i.l.bf16 %v3266_v13 }
 0x31b   : > { %v1558_v27 = vsel %vm1018_vm6, %v1550_v31, %v3262_v62  ;;  %v1534_v32 = vsel %vm1018_vm6, %v1526_v19, %v3263_v29 }
 0x31c   : > { %1698 = vmatprep.mubr.f32.mxu0 %v1558_v27  ;;  %v1543_v6 = vsel %vm983_vm3, %v4457_v40, %v3267_v39  ;;  %v1519_v36 = vsel %vm983_vm3, %v4428_v10, %v3268_v30 }
 0x31d   : > { %v3271_v63 = vpop.permute.xlu1 %3270  ;;  %1699 = vmatmul.mubr.f32.gmra.mrb[20].mxu0 %v1534_v32 }
 0x31e   : > { %v3276_v14 = vpop.permute.xlu0 %3275  ;;  %v3273_v35 = vunpack.i.h.bf16 %v3271_v63  ;;  %v3272_v3 = vunpack.i.l.bf16 %v3271_v63 }
 0x31f   : > { %v3278_v47 = vunpack.i.h.bf16 %v3276_v14  ;;  %v3277_v59 = vunpack.i.l.bf16 %v3276_v14 }
 0x320   : > { %v1551_v49 = vsel %vm479_vm0, %v1543_v6, %v3272_v3  ;;  %v1527_v38 = vsel %vm479_vm0, %v1519_v36, %v3273_v35 }
 0x321   : > { %v3281_v42 = vpop.permute.xlu1 %3280  ;;  %v1559_v45 = vsel %vm1018_vm6, %v1551_v49, %v3277_v59  ;;  %v1535_v48 = vsel %vm1018_vm6, %v1527_v38, %v3278_v47 }
 0x322   : > { %v3286_v44 = vpop.permute.xlu0 %3285  ;;  %v3283_v50 = vunpack.i.h.bf16 %v3281_v42  ;;  %v3282_v34 = vunpack.i.l.bf16 %v3281_v42  ;;  %1703 = vmatprep.mubr.f32.mxu0 %v1559_v45 }
 0x323   : > { %v3288_v52 = vunpack.i.h.bf16 %v3286_v44  ;;  %v3287_v4 = vunpack.i.l.bf16 %v3286_v44  ;;  %1704 = vmatmul.mubr.f32.gmra.mrb[22].mxu0 %v1535_v48 }
 0x324   : > { %v1544_v40 = vsel %vm983_vm3, %v4473_v11, %v3282_v34  ;;  %v1520_v10 = vsel %vm983_vm3, %v4447_v26, %v3283_v50  ;;  %v4622_v34 = vld [vmem:[%s4838_s12] ss:$0 sm:$0xff] }
 0x325   : > { %v3291_v60 = vpop.permute.xlu1 %3290  ;;  %v1552_v22 = vsel %vm479_vm0, %v1544_v40, %v3287_v4  ;;  %v1528_v8 = vsel %vm479_vm0, %v1520_v10, %v3288_v52 }
 0x326   : > { %v3293_v61 = vunpack.i.h.bf16 %v3291_v60  ;;  %v3292_v2 = vunpack.i.l.bf16 %v3291_v60  ;;  %v3296_v17 = vpop.permute.xlu0 %3295 }
 0x327   : > { %v3298_v7 = vunpack.i.h.bf16 %v3296_v17  ;;  %v3297_v24 = vunpack.i.l.bf16 %v3296_v17 }
 0x328   : > { %v1560_v12 = vsel %vm1018_vm6, %v1552_v22, %v3292_v2  ;;  %v1536_v20 = vsel %vm1018_vm6, %v1528_v8, %v3293_v61 }
 0x329   : > { %1708 = vmatprep.mubr.f32.mxu0 %v1560_v12  ;;  %v1545_v53 = vsel %vm983_vm3, %v4492_v54, %v3297_v24  ;;  %v1521_v41 = vsel %vm983_vm3, %v4471_v25, %v3298_v7 }
 0x32a   : > { %1709 = vmatmul.mubr.f32.gmra.mrb[24].mxu0 %v1536_v20 }
 0x32c   : > { %v3301_v11 = vpop.permute.xlu1 %3300 }
 0x32d   : > { %v3306_v57 = vpop.permute.xlu0 %3305  ;;  %v3303_v15 = vunpack.i.h.bf16 %v3301_v11  ;;  %v3302_v26 = vunpack.i.l.bf16 %v3301_v11 }
 0x32e   : > { %v3308_v21 = vunpack.i.h.bf16 %v3306_v57  ;;  %v3307_v33 = vunpack.i.l.bf16 %v3306_v57 }
 0x32f   : > { %v1553_v46 = vsel %vm479_vm0, %v1545_v53, %v3302_v26  ;;  %v1529_v23 = vsel %vm479_vm0, %v1521_v41, %v3303_v15  ;;  %v1323_v41 = vld [vmem:[#allocation3 + $0x92] sm:$0xff] }
 0x330   : > { %v3311_v13 = vpop.permute.xlu1 %3310  ;;  %v1561_v62 = vsel %vm1018_vm6, %v1553_v46, %v3307_v33  ;;  %v1537_v31 = vsel %vm1018_vm6, %v1529_v23, %v3308_v21 }
 0x331   : > { %v3316_v29 = vpop.permute.xlu0 %3315  ;;  %v3313_v19 = vunpack.i.h.bf16 %v3311_v13  ;;  %v3312_v30 = vunpack.i.l.bf16 %v3311_v13  ;;  %1713 = vmatprep.mubr.f32.mxu0 %v1561_v62 }
 0x332   : > { %v3318_v39 = vunpack.i.h.bf16 %v3316_v29  ;;  %v3317_v54 = vunpack.i.l.bf16 %v3316_v29  ;;  %1714 = vmatmul.mubr.f32.gmra.mrb[26].mxu0 %v1537_v31 }
 0x333   : > { %v1546_v25 = vsel %vm983_vm3, %v4509_v5, %v3312_v30  ;;  %v1522_v27 = vsel %vm983_vm3, %v4485_v43, %v3313_v19  ;;  %v4617_v43 = vld [vmem:[%s4837_s11] ss:$0 sm:$0xff] }
 0x334   : > { %v3321_v32 = vpop.permute.xlu1 %3320  ;;  %v1554_v59 = vsel %vm479_vm0, %v1546_v25, %v3317_v54  ;;  %v1530_v6 = vsel %vm479_vm0, %v1522_v27, %v3318_v39 }
 0x335   : > { %v3331_v63 = vpop.permute.xlu0 %3330  ;;  %v3323_v14 = vunpack.i.h.bf16 %v3321_v32  ;;  %v3322_v35 = vunpack.i.l.bf16 %v3321_v32 }
 0x336   : > { %v3333_v3 = vunpack.i.h.bf16 %v3331_v63  ;;  %v3332_v47 = vunpack.i.l.bf16 %v3331_v63 }
 0x337   : > { %v1562_v36 = vsel %vm1018_vm6, %v1554_v59, %v3322_v35  ;;  %v1538_v49 = vsel %vm1018_vm6, %v1530_v6, %v3323_v14 }
 0x338   : > { %v3326_v5 = vpop.permute.xlu1 %3325  ;;  %1718 = vmatprep.mubr.f32.mxu0 %v1562_v36  ;;  %v1547_v52 = vsel %vm983_vm3, %v4522_v58, %v3332_v47  ;;  %v1523_v4 = vsel %vm983_vm3, %v4507_v28, %v3333_v3 }
 0x339   : > { %v3336_v38 = vpop.permute.xlu0 %3335  ;;  %v3328_v42 = vunpack.i.h.bf16 %v3326_v5  ;;  %v3327_v44 = vunpack.i.l.bf16 %v3326_v5  ;;  %1719 = vmatmul.mubr.f32.gmra.mrb[28].mxu0 %v1538_v49 }
 0x33a   : > { %v3338_v45 = vunpack.i.h.bf16 %v3336_v38  ;;  %v3337_v48 = vunpack.i.l.bf16 %v3336_v38 }
 0x33b   : > { %v2392_v50 = vpop.f32.mrb[16].mxu1  ;;  %v1555_v60 = vsel %vm479_vm0, %v1547_v52, %v3327_v44  ;;  %v1531_v61 = vsel %vm479_vm0, %v1523_v4, %v3328_v42 }
 0x33c   : > { %v2438_v40 = vmul.f32 %v4617_v43, %v2392_v50  ;;  %v2394_v10 = vpop.f32.mrb[17].mxu1  ;;  %v4631_v2 = vpop.permute.xlu1 %2501  ;;  %v1563_v22 = vsel %vm1018_vm6, %v1555_v60, %v3337_v48  ;;  %v1539_v8 = vsel %vm1018_vm6, %v1531_v61, %v3338_v45 }
 0x33d   : > { %v4633_v17 = vpop.permute.xlu0 %2503  ;;  %2542 = vst.msk [vmem:[%s4638_s20 + $0x8] sm:$0xff] %vm479_vm0, %v4631_v2  ;;  %1723 = vmatprep.mubr.f32.mxu0 %v1563_v22 }
 0x33e   : > { %v2453_v58 = vadd.f32 %v4622_v34, %v2438_v40  ;;  %2544 = vst.msk [vmem:[%s4638_s20 + $0x18] sm:$0xff] %vm479_vm0, %v4633_v17  ;;  %1724 = vmatmul.mubr.f32.gmra.mrb[30].mxu0 %v1539_v8 }
 0x33f   : > { %v2397_v28 = vpop.f32.mrb[18].mxu1  ;;  %2763 = vmatprep.mubr.msk.f32.mxu0 %vm983_vm3, %v4414_v1 }
 0x340   : > { %v2461_v12 = vmax.f32 %v2453_v58, 0.0  ;;  %v2439_v20 = vmul.f32 %v4617_v43, %v2397_v28  ;;  %v2399_v7 = vpop.f32.mrb[19].mxu1  ;;  %v4649_v24 = vpop.permute.xlu1 %2505 }
 0x341   : > { %v4651_v11 = vpop.permute.xlu0 %2507  ;;  %2546 = vst.msk [vmem:[%s4638_s20 + $0x28] sm:$0xff] %vm479_vm0, %v4649_v24 }
 0x342   : > { %v2454_v57 = vadd.f32 %v4622_v34, %v2439_v20  ;;  %2548 = vst.msk [vmem:[%s4638_s20 + $0x38] sm:$0xff] %vm479_vm0, %v4651_v11  ;;  %2477 = vrot.lane.b32.xlu1 %v2461_v12, %s4861_s27  ;;  %2764 = vmatmul.mubr.msk.f32.vlgmr.msra.gmra.mrb[32].mxu0 %vm983_vm3, %v4436_v16 }
 0x343   : > { %2766 = vmatprep.mubr.msk.f32.mxu0 %vm983_vm3, %v4459_v56 }
 0x344   : > { %v2462_v15 = vmax.f32 %v2454_v57, 0.0  ;;  %v4665_v1 = vpop.permute.xlu1 %2509 }
 0x345   : > { %v4667_v26 = vpop.permute.xlu0 %2511  ;;  %2550 = vst.msk [vmem:[%s4638_s20 + $0x48] sm:$0xff] %vm479_vm0, %v4665_v1 }
 0x346   : > { %2552 = vst.msk [vmem:[%s4638_s20 + $0x58] sm:$0xff] %vm479_vm0, %v4667_v26  ;;  %2479 = vrot.lane.b32.xlu0 %v2462_v15, %s4861_s27  ;;  %2767 = vmatmul.mubr.msk.f32.gmra.mrb[34].mxu0 %vm983_vm3, %v4480_v37 }
 0x347   : > { %2769 = vmatprep.mubr.msk.f32.mxu0 %vm983_vm3, %v4494_v55 }
 0x348   : > { %v2402_v16 = vpop.f32.mrb[20].mxu1 }
 0x349   : > { %v2440_v56 = vmul.f32 %v4617_v43, %v2402_v16  ;;  %v2404_v21 = vpop.f32.mrb[21].mxu1 }
 0x34a   : > { %2770 = vmatmul.mubr.msk.f32.gmra.mrb[36].mxu0 %vm983_vm3, %v4515_v0 }
 0x34b   : > { %v2455_v33 = vadd.f32 %v4622_v34, %v2440_v56  ;;  %2772 = vmatprep.mubr.msk.f32.mxu0 %vm983_vm3, %v4524_v51 }
 0x34c   : > { %v2407_v53 = vpop.f32.mrb[22].mxu1 }
 0x34d   : > { %v2463_v46 = vmax.f32 %v2455_v33, 0.0  ;;  %v2441_v37 = vmul.f32 %v4617_v43, %v2407_v53  ;;  %v2409_v23 = vpop.f32.mrb[23].mxu1 }
 0x34e   : > { %2773 = vmatmul.mubr.msk.f32.gmra.mrb[38].mxu0 %vm983_vm3, %v1323_v41  ;;  %v2668_v23 = vld [vmem:[%s4834_s8] ss:$0 sm:$0xff] }
 0x34f   : > { %v2456_v55 = vadd.f32 %v4622_v34, %v2441_v37  ;;  %2481 = vrot.lane.b32.xlu1 %v2463_v46, %s4861_s27 }
 0x351   : > { %v2464_v13 = vmax.f32 %v2456_v55, 0.0 }
 0x353   : > { %2483 = vrot.lane.b32.xlu0 %v2464_v13, %s4861_s27 }
 0x357   : > { %v2412_v29 = vpop.f32.mrb[24].mxu1 }
 0x358   : > { %v2442_v0 = vmul.f32 %v4617_v43, %v2412_v29  ;;  %v2414_v62 = vpop.f32.mrb[25].mxu1  ;;  %v2669_v29 = vld [vmem:[%s4835_s9] ss:$0 sm:$0xff] }
 0x35a   : > { %v2457_v51 = vadd.f32 %v4622_v34, %v2442_v0 }
 0x35b   : > { %v2417_v31 = vpop.f32.mrb[26].mxu1 }
 0x35c   : > { %v2465_v19 = vmax.f32 %v2457_v51, 0.0  ;;  %v2443_v30 = vmul.f32 %v4617_v43, %v2417_v31  ;;  %v2419_v39 = vpop.f32.mrb[27].mxu1 }
 0x35e   : > { %v2458_v54 = vadd.f32 %v4622_v34, %v2443_v30  ;;  %2485 = vrot.lane.b32.xlu1 %v2465_v19, %s4861_s27 }
 0x360   : > { %v2466_v25 = vmax.f32 %v2458_v54, 0.0 }
 0x362   : > { %2487 = vrot.lane.b32.xlu0 %v2466_v25, %s4861_s27 }
 0x364   : > { %v2422_v27 = vpop.f32.mrb[28].mxu1 }
 0x365   : > { %v2444_v32 = vmul.f32 %v4617_v43, %v2422_v27  ;;  %v2424_v63 = vpop.f32.mrb[29].mxu1 }
 0x367   : > { %v2459_v14 = vadd.f32 %v4622_v34, %v2444_v32 }
 0x368   : > { %v2427_v35 = vpop.f32.mrb[30].mxu1 }
 0x369   : > { %v2467_v3 = vmax.f32 %v2459_v14, 0.0  ;;  %v2445_v47 = vmul.f32 %v4617_v43, %v2427_v35  ;;  %v2429_v59 = vpop.f32.mrb[31].mxu1 }
 0x36b   : > { %v2460_v6 = vadd.f32 %v4622_v34, %v2445_v47  ;;  %2489 = vrot.lane.b32.xlu1 %v2467_v3, %s4861_s27 }
 0x36d   : > { %v2468_v36 = vmax.f32 %v2460_v6, 0.0 }
 0x36f   : > { %2513 = vrot.lane.b32.xlu1 %v3871_v18, %s4862_s21  ;;  %2491 = vrot.lane.b32.xlu0 %v2468_v36, %s4861_s27  ;;  %s3412_s27 = smov [#allocation4]  }
 0x373   : > { %2515 = vrot.lane.b32.xlu0 %v3888_v9, %s4862_s21  ;;  %s3343_s21 = sshll.u32 %s3412_s27, 4  ;;  %s3344_s21 = int_to_ptr.vmem [resolvable:$false] %s3343_s21 }
 0x374   : > { %s3345_s22 = scalar_lea.vmem %s3344_s21, 4096  ;;  %p3346_p0 = scmp.lt.s32.totalorder %s4776_s24, %s3344_s21 }
 0x375   : > { %p3347_p1 = scmp.lt.s32.totalorder %s3345_s22, %s3339_s0 }
 0x377   : > { %p3348_p2 = por %p3347_p1, %p3346_p0 }
 0x379   : > { %p3349_p3 = pnand %p3348_p2, %p3342_p13 }
 0x3b4   : > { %v2478_v49 = vpop.permute.xlu1 %2477 }
 0x3b8   : > { %v2480_v5 = vpop.permute.xlu0 %2479 }
 0x3c1   : > { %v4707_v38 = vpop.permute.xlu1 %2481 }
 0x3c5   : > { %v4709_v43 = vpop.permute.xlu0 %2483 }
 0x3d0   : > { %v4711_v42 = vpop.permute.xlu1 %2485 }
 0x3d4   : > { %v4713_v44 = vpop.permute.xlu0 %2487 }
 0x3dd   : > { %v4715_v45 = vpop.permute.xlu1 %2489 }
 0x3df   : > { %v2719_v48 = vpop.f32.mrb[16].mxu0 }
 0x3e0   : > { %v2720_v18 = vpop.f32.mrb[17].mxu0 }
 0x3e1   : > { %v2721_v50 = vadd.f32 %v2720_v18, %v2719_v48  ;;  %v4717_v34 = vpop.permute.xlu1 %2513  ;;  %v4719_v52 = vpop.permute.xlu0 %2491 }
 0x3e2   : > { %2554 = vst.msk [vmem:[%s4638_s20 + $0x68] sm:$0xff] %vm479_vm0, %v4717_v34 }
 0x3e5   : > { %v4724_v9 = vpop.permute.xlu0 %2515 }
 0x3e6   : > { %2556 = vst.msk [vmem:[%s4638_s20 + $0x78] sm:$0xff] %vm479_vm0, %v4724_v9 }
 0x3e9   : > { %v2722_v4 = vpop.f32.mrb[18].mxu0 }
 0x3ea   : > { %v2723_v40 = vpop.f32.mrb[19].mxu0 }
 0x3eb   : > { %v2724_v10 = vadd.f32 %v2723_v40, %v2722_v4 }
 0x3f0   : > { %v2725_v60 = vpop.f32.mrb[20].mxu0 }
 0x3f1   : > { %v2726_v61 = vpop.f32.mrb[21].mxu0 }
 0x3f2   : > { %v2727_v22 = vadd.f32 %v2726_v61, %v2725_v60 }
 0x3f6   : > { %v2728_v8 = vpop.f32.mrb[22].mxu0 }
 0x3f7   : > { %v2729_v58 = vpop.f32.mrb[23].mxu0 }
 0x3f8   : > { %v2730_v28 = vadd.f32 %v2729_v58, %v2728_v8 }
 0x3fd   : > { %v2731_v12 = vpop.f32.mrb[24].mxu0 }
 0x3fe   : > { %v2732_v20 = vpop.f32.mrb[25].mxu0 }
 0x3ff   : > { %v2733_v7 = vadd.f32 %v2732_v20, %v2731_v12 }
 0x405   : > { %v2734_v57 = vpop.f32.mrb[26].mxu0 }
 0x406   : > { %v2735_v15 = vpop.f32.mrb[27].mxu0 }
 0x407   : > { %v2736_v16 = vadd.f32 %v2735_v15, %v2734_v57 }
 0x40c   : > { %v2737_v56 = vpop.f32.mrb[28].mxu0 }
 0x40d   : > { %v2738_v21 = vpop.f32.mrb[29].mxu0 }
 0x40e   : > { %v2739_v33 = vadd.f32 %v2738_v21, %v2737_v56 }
 0x411   : > { %v2740_v53 = vpop.f32.mrb[30].mxu0 }
 0x412   : > { %v2741_v41 = vpop.f32.mrb[31].mxu0 }
 0x413   : > { %v2742_v46 = vadd.f32 %v2741_v41, %v2740_v53 }
 0x415   : > { %v2765_v37 = vpop.f32.mrb[32].mxu0 }
 0x416   : > { %v1801_v55 = vadd.f32 %v2765_v37, %v2724_v10  ;;  %v1795_v13 = vpop.f32.mrb[33].mxu0 }
 0x417   : > { %v1796_v0 = vadd.f32 %v2721_v50, %v1795_v13 }
 0x418   : > { %v1842_v62 = vmul.f32 %v2668_v23, %v1801_v55 }
 0x419   : > { %v1841_v51 = vmul.f32 %v2668_v23, %v1796_v0  ;;  %v2768_v31 = vpop.f32.mrb[34].mxu0 }
 0x41a   : > { %v1857_v19 = vadd.f32 %v2669_v29, %v1842_v62  ;;  %v1811_v30 = vadd.f32 %v2768_v31, %v2730_v28  ;;  %v1805_v39 = vpop.f32.mrb[35].mxu0 }
 0x41b   : > { %v1856_v54 = vadd.f32 %v2669_v29, %v1841_v51  ;;  %v1806_v25 = vadd.f32 %v2727_v22, %v1805_v39 }
 0x41c   : > { %v1865_v27 = vmax.f32 %v1857_v19, 0.0  ;;  %v1844_v32 = vmul.f32 %v2668_v23, %v1811_v30 }
 0x41d   : > { %v1864_v63 = vmax.f32 %v1856_v54, 0.0  ;;  %v1843_v14 = vmul.f32 %v2668_v23, %v1806_v25  ;;  %v2771_v35 = vpop.f32.mrb[36].mxu0 }
 0x41e   : > { %v2526_v3 = vsel %vm983_vm3, %v1865_v27, %v2480_v5  ;;  %v1859_v47 = vadd.f32 %v2669_v29, %v1844_v32  ;;  %v1821_v59 = vadd.f32 %v2771_v35, %v2736_v16  ;;  %v1815_v6 = vpop.f32.mrb[37].mxu0 }
 0x41f   : > { %v2534_v36 = vsel %vm1018_vm6, %v2526_v3, %v4633_v17  ;;  %v2525_v48 = vsel %vm983_vm3, %v1864_v63, %v2478_v49  ;;  %v1858_v18 = vadd.f32 %v2669_v29, %v1843_v14  ;;  %v1816_v50 = vadd.f32 %v2733_v7, %v1815_v6 }
 0x420   : > { %2543 = vst [vmem:[%s4638_s20 + $0x10] sm:$0xff] %v2534_v36  ;;  %v2533_v4 = vsel %vm1018_vm6, %v2525_v48, %v4631_v2  ;;  %v1867_v40 = vmax.f32 %v1859_v47, 0.0  ;;  %v1846_v10 = vmul.f32 %v2668_v23, %v1821_v59 }
 0x421   : > { %2541 = vst [vmem:[%s4638_s20] sm:$0xff] %v2533_v4  ;;  %v1866_v5 = vmax.f32 %v1858_v18, 0.0  ;;  %v1845_v60 = vmul.f32 %v2668_v23, %v1816_v50  ;;  %v2774_v61 = vpop.f32.mrb[38].mxu0 }
 0x422   : > { %v2528_v22 = vsel %vm983_vm3, %v1867_v40, %v4709_v43  ;;  %v1861_v17 = vadd.f32 %v2669_v29, %v1846_v10  ;;  %v1831_v8 = vadd.f32 %v2774_v61, %v2742_v46  ;;  %v1825_v49 = vpop.f32.mrb[39].mxu0 }
 0x423   : > { %v2536_v58 = vsel %vm1018_vm6, %v2528_v22, %v4651_v11  ;;  %v2527_v2 = vsel %vm983_vm3, %v1866_v5, %v4707_v38  ;;  %v1860_v28 = vadd.f32 %v2669_v29, %v1845_v60  ;;  %v1826_v12 = vadd.f32 %v2739_v33, %v1825_v49 }
 0x424   : > { %2547 = vst [vmem:[%s4638_s20 + $0x30] sm:$0xff] %v2536_v58  ;;  %v2535_v20 = vsel %vm1018_vm6, %v2527_v2, %v4649_v24  ;;  %v1869_v43 = vmax.f32 %v1861_v17, 0.0  ;;  %v1848_v7 = vmul.f32 %v2668_v23, %v1831_v8 }
 0x425   : > { %2545 = vst [vmem:[%s4638_s20 + $0x20] sm:$0xff] %v2535_v20  ;;  %v1868_v57 = vmax.f32 %v1860_v28, 0.0  ;;  %v1847_v15 = vmul.f32 %v2668_v23, %v1826_v12 }
 0x426   : > { %v2530_v11 = vsel %vm983_vm3, %v1869_v43, %v4713_v44  ;;  %v1863_v16 = vadd.f32 %v2669_v29, %v1848_v7 }
 0x427   : > { %v2538_v38 = vsel %vm1018_vm6, %v2530_v11, %v4667_v26  ;;  %v2529_v56 = vsel %vm983_vm3, %v1868_v57, %v4711_v42  ;;  %v1862_v21 = vadd.f32 %v2669_v29, %v1847_v15 }
 0x428   : > { %2551 = vst [vmem:[%s4638_s20 + $0x50] sm:$0xff] %v2538_v38  ;;  %v2537_v24 = vsel %vm1018_vm6, %v2529_v56, %v4665_v1  ;;  %v1871_v33 = vmax.f32 %v1863_v16, 0.0 }
 0x429   : > { %2549 = vst [vmem:[%s4638_s20 + $0x40] sm:$0xff] %v2537_v24  ;;  %v1870_v44 = vmax.f32 %v1862_v21, 0.0 }
 0x42a   : > { %v2532_v53 = vsel %vm983_vm3, %v1871_v33, %v4719_v52 }
 0x42b   : > { %v2540_v26 = vsel %vm1018_vm6, %v2532_v53, %v4724_v9  ;;  %v2531_v42 = vsel %vm983_vm3, %v1870_v44, %v4715_v45 }
 0x42c   : > { %2555 = vst [vmem:[%s4638_s20 + $0x70] sm:$0xff] %v2540_v26  ;;  %v2539_v1 = vsel %vm1018_vm6, %v2531_v42, %v4717_v34 }
 0x42d   : > { %2553 = vst [vmem:[%s4638_s20 + $0x60] sm:$0xff] %v2539_v1 }
 0x42e   : > { %3352 = shalt.err (!%p3349_p3)
}
 0x42f   : > { %s3353_s14 = scalar_lea.hbm %s4770_s16, 2048  ;;  %s3357_s23 = scalar_lea.hbm %s4839_s13, 4096 }
 0x430   : > { %p3354_p4 = scmp.ne.s32.totalorder %s4770_s16, %s3353_s14  ;;  %p3358_p9 = scmp.lt.u32.totalorder %s4770_s16, %s4839_s13 }
 0x431   : > { %p3359_p10 = scmp.lt.u32.totalorder %s3357_s23, %s3353_s14  ;;  %p3361_p12 = scmp.lt.u32.totalorder %s3353_s14, %s4770_s16 }
 0x432   : > { %p3355_p7 = pnand %p3354_p4, %p3522_p5 }
 0x433   : > { %p3360_p11 = por %p3359_p10, %p3358_p9 }
 0x434   : > { %p3356_p8 = pneg %p3355_p7 }
 0x435   : > { %p3362_p13 = por %p3361_p12, %p3360_p11 }
 0x437   : > { %p3363_p0 = pnand %p3362_p13, %p3356_p8 }
 0x439   : > { %3366 = shalt.err (!%p3363_p0)
}
 0x43a   : > { %s3413_s0 = smov 256   ;;  %s4863_s27 = smov 16  }
 0x43b   : > { %2905 = dma.vmem_to_hbm [thread:$0]  (%p3522_p5), %s4776_s24, 2048, %s4770_s16, %s4784_s29, %s3413_s0, %s3413_s0, %s4863_s27  }
 0x43c PF: > { %p2911_p1 = scmp.ge.s32.totalorder %s3401_s28, 2  ;;  %s2586_s21 = sand.u32 1, %s3389_s25  }
 0x43d   : > { %s2587_s22 = scalar_lea.sflag [#allocation5], %s2586_s21 }
 0x43e   : > { %p2908_p2 = pnand %p2911_p1, %p3526_p6 }
 0x440   : > { %3384 = dma.done.wait (!%p2908_p2), %s2587_s22, 2048  }
 0x441   : > { %3386 = vsyncadd (!%p2908_p2), %s2587_s22, 4294965248  ;;  %s4864_s28 = sld [smem:[#allocation8_spill]]  ;;  %s4865_s14 = sld [smem:[#allocation7_spill]] }
 0x442   : > { %s4866_s27 = sld [smem:[#allocation9_spill]]  ;;  %s4867_s25 = smov %s3393_s26 }
 0x447   : > { %p23_p3 = scmp.ge.s32.totalorder %s4864_s28, 4   ;;  %s4868_s26 = smov %s4865_s14 }
 0x449   :  { %25 = sbr.rel (!%p23_p3) target bundleno = 5 (0x5), region = 111 }
 0x450   :  { %2592 = vsyncpa [#allocation5], 1 }
 0x451   :  { %2594 = vsyncpa [#allocation5 + $0x1], 1 }

</bundles_post_ra>
